<compile_context>
chip_gen: v6e
topology: v6e:2x2x1
jax: 0.10.0
libtpu: 0.0.40
codegen_flags: <defaults>
</compile_context>

<pallas_src>
import functools
import math

import jax
import jax.numpy as jnp
from jax import lax
from jax.experimental import pallas as pl
from jax.experimental.pallas import tpu as pltpu


def _round_up(x, m):
    return ((x + m - 1) // m) * m


def _gram(a, b):
    # a @ b.T without an explicit transpose (contract on dim 1 of both); f32 accumulate.
    return lax.dot_general(a, b, (((1,), (1,)), ((), ())),
                           preferred_element_type=jnp.float32)


def _row_normalize(x):
    # F.normalize(x, dim=1): x / max(||x||, 1e-12) == x * rsqrt(max(||x||^2, 1e-24))
    ss = jnp.sum(x * x, axis=1, keepdims=True)
    return x * lax.rsqrt(jnp.maximum(ss, 1e-24))


def _global_max(x):
    # full max kept as a (1, 1) vreg value (broadcast-multiply stays in the vector domain)
    return jnp.max(jnp.max(x, axis=1, keepdims=True), axis=0, keepdims=True)


def interaction_loss_kernel(data_ref, out_ref, *, n, d, g,
                            off_idx, off_ge, off_gi, inv_temp):
    inv_n = 1.0 / n
    inv_n2 = 1.0 / (n * n)
    bf16 = jnp.bfloat16

    row_i = lax.broadcasted_iota(jnp.int32, (n, n), 0)
    col_i = lax.broadcasted_iota(jnp.int32, (n, n), 1)
    not_diag = row_i != col_i                                       # bool (N, N)

    # ---- shared: normalized embedding similarity (bf16 operands, f32 accumulate) ----
    emb = data_ref[0:n, 0:d]                                        # (N, D) f32
    e = _row_normalize(emb).astype(bf16)
    emb_sims = _gram(e, e)                                          # (N, N) f32, diag ~ 1

    # ---------------- cell-type contrastive loss ----------------
    # labels via VPU broadcast compare of the precomputed argmax index (exact f32 ints).
    idx_col = data_ref[0:n, d + 8:d + 9]                            # (N, 1)
    idx_row = data_ref[off_idx:off_idx + 1, 0:n]                    # (1, N)
    pos_mask = jnp.logical_and(idx_col == idx_row, not_diag)        # bool (N, N)
    # log-softmax with a constant shift: rows are bounded by the (unit) diagonal,
    # and log-softmax is shift-invariant, so no per-row XLU max is needed.
    shifted = (emb_sims - 1.0) * inv_temp                           # == sim - 1/T
    lse = jnp.log(jnp.sum(jnp.exp(shifted), axis=1, keepdims=True))  # (N, 1)
    pos_sum = jnp.sum(jnp.where(pos_mask, shifted, 0.0), axis=1, keepdims=True)
    pos_count = jnp.sum(jnp.where(pos_mask, 1.0, 0.0), axis=1, keepdims=True)
    # -(sum((shifted-lse)*labels)) / clamp(pos_count,1), without materializing log_probs
    per_row = ((pos_count * lse - pos_sum)
               * pl.reciprocal(jnp.maximum(pos_count, 1.0), approx=True))
    contrastive = jnp.sum(per_row) * inv_n

    # ---------------- spatial regularization loss ----------------
    # pairwise squared distances from one augmented K=4 gram; stays f32 (cancellation).
    pos_a = data_ref[0:n, d:d + 4]                                  # [x, y, |p|^2, 1]
    pos_b = data_ref[0:n, d + 4:d + 8]                              # [-2x, -2y, 1, |p|^2]
    d2 = jnp.maximum(_gram(pos_a, pos_b), 0.0)                      # (N, N)
    dist = jnp.sqrt(d2)
    dist = dist * pl.reciprocal(_global_max(dist), approx=True)
    diff_s = jnp.where(not_diag, emb_sims - (1.0 - dist), 0.0)
    spatial = jnp.sum(diff_s * diff_s) * inv_n2

    # ---------------- gene interaction loss ----------------
    ge = data_ref[off_ge:off_ge + n, 0:g]                           # (N, G) f32
    gexpr = _row_normalize(ge).astype(bf16)
    gint = data_ref[off_gi:off_gi + g, 0:g].astype(bf16)            # (G, G)
    tmp = jnp.dot(gexpr, gint, preferred_element_type=jnp.float32)  # (N, G), K=G matmul
    expected = _gram(tmp.astype(bf16), gexpr)                       # (N, N), K=G matmul
    expected = expected * pl.reciprocal(_global_max(expected), approx=True)
    diff_i = jnp.where(not_diag, emb_sims - expected, 0.0)
    interaction = jnp.sum(diff_i * diff_i) * inv_n2

    out_ref[0] = contrastive
    out_ref[1] = spatial
    out_ref[2] = interaction


def interaction_loss(embeddings, cell_types, spatial_coords, gene_expression,
                     gene_interactions, *, temperature=0.1,
                     contrastive_weight=1.0, spatial_weight=1.0,
                     interaction_weight=1.0):
    f32 = jnp.float32
    emb = embeddings.astype(f32)
    pos = spatial_coords.astype(f32)
    ge = gene_expression.astype(f32)
    gi = gene_interactions.astype(f32)
    n, d = emb.shape
    g = gi.shape[0]

    # Wrapper-side (cheap, O(N)) prep:
    # mean-center coordinates (translation-invariant distances, better f32 cancellation),
    # build the augmented-gram coordinate factors, and the cell-type argmax index.
    pos = pos - jnp.mean(pos, axis=0, keepdims=True)
    sq = jnp.sum(pos * pos, axis=1, keepdims=True)                  # (N, 1)
    ones = jnp.ones_like(sq)
    pos_a = jnp.concatenate([pos, sq, ones], axis=1)                # (N, 4)
    pos_b = jnp.concatenate([-2.0 * pos, ones, sq], axis=1)         # (N, 4)
    idx = jnp.argmax(cell_types, axis=1).astype(f32)                # (N,) exact small ints

    # Pack EVERYTHING into one lane-dense, row-concatenated slab -> one DMA.
    lanes = _round_up(max(d + 9, n, g), 128)
    npad = _round_up(n, 8)
    gpad = _round_up(g, 8)
    off_idx = npad                      # 8-aligned section offsets (cheap static slices)
    off_ge = npad + 8
    off_gi = npad + 8 + npad

    def pad(x, r, c):
        return jnp.pad(x, ((0, r - x.shape[0]), (0, c - x.shape[1])))

    sec0 = pad(jnp.concatenate([emb, pos_a, pos_b, idx[:, None]], axis=1), npad, lanes)
    sec1 = pad(idx[None, :], 8, lanes)                              # idx as a row
    sec2 = pad(ge, npad, lanes)
    sec3 = pad(gi, gpad, lanes)
    data = jnp.concatenate([sec0, sec1, sec2, sec3], axis=0)        # (R, lanes) f32

    kernel = functools.partial(interaction_loss_kernel, n=n, d=d, g=g,
                               off_idx=off_idx, off_ge=off_ge, off_gi=off_gi,
                               inv_temp=1.0 / float(temperature))
    losses = pl.pallas_call(
        kernel,
        out_shape=jax.ShapeDtypeStruct((3,), f32),
        in_specs=[pl.BlockSpec(memory_space=pltpu.MemorySpace.VMEM)],
        out_specs=pl.BlockSpec(memory_space=pltpu.MemorySpace.SMEM),
    )(data)

    contrastive = contrastive_weight * losses[0]
    spatial = spatial_weight * losses[1]
    interaction = interaction_weight * losses[2]
    total = contrastive + spatial + interaction
    # Keep device scalars (no host sync) so this stays usable inside a jitted step.
    loss_dict = {
        'contrastive_loss': contrastive,
        'spatial_loss': spatial,
        'interaction_loss': interaction,
        'total_loss': total,
    }
    return total, loss_dict


# ---------------------------------------------------------------------------
# Pure-JAX reference (mirrors the PyTorch module) for correctness checking.
# ---------------------------------------------------------------------------
def _reference_total(embeddings, cell_types, spatial_coords, gene_expression,
                     gene_interactions, temperature=0.1):
    def normalize(x):
        return x / jnp.maximum(jnp.linalg.norm(x, axis=1, keepdims=True), 1e-12)

    n = embeddings.shape[0]
    eye = jnp.eye(n, dtype=jnp.float32)
    off = 1.0 - eye
    e = normalize(embeddings)
    emb_sims = e @ e.T

    # contrastive
    sim = emb_sims / temperature
    idx = jnp.argmax(cell_types, axis=1)
    labels = (idx[None, :] == idx[:, None]).astype(jnp.float32) * off
    log_probs = jax.nn.log_softmax(sim, axis=1)
    contrastive = jnp.mean(-jnp.sum(log_probs * labels, axis=1)
                           / jnp.maximum(jnp.sum(labels, axis=1), 1.0))

    # spatial
    d = jnp.sqrt(jnp.maximum(
        jnp.sum((spatial_coords[:, None, :] - spatial_coords[None, :, :]) ** 2,
                axis=-1), 0.0))
    d = d / jnp.max(d)
    spatial = jnp.mean(((emb_sims * off) - ((1.0 - d) * off)) ** 2)

    # interaction
    g = normalize(gene_expression)
    expected = g @ gene_interactions @ g.T
    expected = expected / jnp.max(expected)
    interaction = jnp.mean(((emb_sims * off) - (expected * off)) ** 2)

    return contrastive + spatial + interaction


if __name__ == "__main__":
    key = jax.random.PRNGKey(0)
    k1, k2, k3, k4, k5 = jax.random.split(key, 5)

    N, D, G, C = 128, 32, 128, 8
    embeddings = jax.random.normal(k1, (N, D), dtype=jnp.float32)
    cell_type_idx = jax.random.randint(k2, (N,), 0, C)
    cell_types = jax.nn.one_hot(cell_type_idx, C, dtype=jnp.float32)
    spatial_coords = jax.random.uniform(k3, (N, 2), dtype=jnp.float32) * 100.0
    gene_expression = jax.random.uniform(k4, (N, G), dtype=jnp.float32)
    gene_interactions = jax.random.uniform(k5, (G, G), dtype=jnp.float32)
    gene_interactions = 0.5 * (gene_interactions + gene_interactions.T)

    total, loss_dict = interaction_loss(
        embeddings, cell_types, spatial_coords, gene_expression,
        gene_interactions, temperature=0.1,
        contrastive_weight=1.0, spatial_weight=1.0, interaction_weight=1.0)
    jax.block_until_ready(total)

    ref = float(_reference_total(embeddings, cell_types, spatial_coords,
                                 gene_expression, gene_interactions,
                                 temperature=0.1))
    got = float(total)
    assert math.isfinite(got)
    assert math.isclose(got, ref, rel_tol=2e-3, abs_tol=1e-4), (got, ref)

    print("KERNEL_OK")
</pallas_src>

<mosaic_0001>
module attributes {stable_mosaic.version = 11 : i64} {
  func.func @interaction_loss_kernel(%arg0: memref<392x128xf32, #tpu.memory_space<vmem>>, %arg1: memref<3xf32, #tpu.memory_space<smem>>) attributes {dimension_semantics = [], scalar_prefetch = 0 : i64, scratch_operands = 0 : i64, tpu.core_type = #tpu.core_type<tc>} {
    %0 = tpu.iota {dimensions = array<i32: 0>} : vector<128x128xi32>
    %1 = tpu.iota {dimensions = array<i32: 1>} : vector<128x128xi32>
    %2 = arith.cmpi ne, %0, %1 : vector<128x128xi32>
    %c0 = arith.constant 0 : index
    %c0_0 = arith.constant 0 : index
    %3 = vector.load %arg0[%c0, %c0_0] : memref<392x128xf32, #tpu.memory_space<vmem>>, vector<128x32xf32>
    %4 = arith.mulf %3, %3 : vector<128x32xf32>
    %cst = arith.constant dense<0.000000e+00> : vector<128xf32>
    %5 = vector.multi_reduction <add>, %4, %cst [1] : vector<128x32xf32> to vector<128xf32>
    %6 = vector.shape_cast %5 : vector<128xf32> to vector<128x1xf32>
    %cst_1 = arith.constant 1.000000e-24 : f32
    %7 = vector.broadcast %cst_1 : f32 to vector<128x1xf32>
    %8 = arith.maximumf %6, %7 : vector<128x1xf32>
    %9 = math.rsqrt %8 : vector<128x1xf32>
    %10 = vector.broadcast %9 : vector<128x1xf32> to vector<128x32xf32>
    %11 = arith.mulf %3, %10 : vector<128x32xf32>
    %12 = arith.truncf %11 : vector<128x32xf32> to vector<128x32xbf16>
    %cst_2 = arith.constant dense<0.000000e+00> : vector<128x128xf32>
    %13 = tpu.matmul %12, %12, %cst_2 {dimension_numbers = #tpu.dot_dimension_numbers<[1], [1], [0], [0], [0, 0, 1, 0], [], []>} : vector<128x32xbf16>, vector<128x32xbf16>, vector<128x128xf32> -> vector<128x128xf32>
    %c0_3 = arith.constant 0 : index
    %c40 = arith.constant 40 : index
    %14 = vector.load %arg0[%c0_3, %c40] : memref<392x128xf32, #tpu.memory_space<vmem>>, vector<128x1xf32>
    %c128 = arith.constant 128 : index
    %c0_4 = arith.constant 0 : index
    %15 = vector.load %arg0[%c128, %c0_4] : memref<392x128xf32, #tpu.memory_space<vmem>>, vector<1x128xf32>
    %16 = vector.broadcast %14 : vector<128x1xf32> to vector<128x128xf32>
    %17 = vector.broadcast %15 : vector<1x128xf32> to vector<128x128xf32>
    %18 = arith.cmpf oeq, %16, %17 : vector<128x128xf32>
    %19 = arith.andi %18, %2 : vector<128x128xi1>
    %cst_5 = arith.constant 1.000000e+00 : f32
    %20 = vector.broadcast %cst_5 : f32 to vector<128x128xf32>
    %21 = arith.subf %13, %20 : vector<128x128xf32>
    %cst_6 = arith.constant 1.000000e+01 : f32
    %22 = vector.broadcast %cst_6 : f32 to vector<128x128xf32>
    %23 = arith.mulf %21, %22 : vector<128x128xf32>
    %24 = math.exp %23 : vector<128x128xf32>
    %cst_7 = arith.constant dense<0.000000e+00> : vector<128xf32>
    %25 = vector.multi_reduction <add>, %24, %cst_7 [1] : vector<128x128xf32> to vector<128xf32>
    %26 = vector.shape_cast %25 : vector<128xf32> to vector<128x1xf32>
    %27 = math.log %26 : vector<128x1xf32>
    %cst_8 = arith.constant 0.000000e+00 : f32
    %28 = vector.broadcast %cst_8 : f32 to vector<128x128xf32>
    %29 = arith.select %19, %23, %28 : vector<128x128xi1>, vector<128x128xf32>
    %cst_9 = arith.constant dense<0.000000e+00> : vector<128xf32>
    %30 = vector.multi_reduction <add>, %29, %cst_9 [1] : vector<128x128xf32> to vector<128xf32>
    %31 = vector.shape_cast %30 : vector<128xf32> to vector<128x1xf32>
    %cst_10 = arith.constant 1.000000e+00 : f32
    %cst_11 = arith.constant 0.000000e+00 : f32
    %32 = vector.broadcast %cst_10 : f32 to vector<128x128xf32>
    %33 = vector.broadcast %cst_11 : f32 to vector<128x128xf32>
    %34 = arith.select %19, %32, %33 : vector<128x128xi1>, vector<128x128xf32>
    %cst_12 = arith.constant dense<0.000000e+00> : vector<128xf32>
    %35 = vector.multi_reduction <add>, %34, %cst_12 [1] : vector<128x128xf32> to vector<128xf32>
    %36 = vector.shape_cast %35 : vector<128xf32> to vector<128x1xf32>
    %37 = arith.mulf %36, %27 : vector<128x1xf32>
    %38 = arith.subf %37, %31 : vector<128x1xf32>
    %cst_13 = arith.constant 1.000000e+00 : f32
    %39 = vector.broadcast %cst_13 : f32 to vector<128x1xf32>
    %40 = arith.maximumf %36, %39 : vector<128x1xf32>
    %41 = tpu.reciprocal %40 {approx = true} : vector<128x1xf32> -> vector<128x1xf32>
    %42 = arith.mulf %38, %41 : vector<128x1xf32>
    %43 = vector.shape_cast %42 : vector<128x1xf32> to vector<1x128x1xf32>
    %cst_14 = arith.constant dense<0.000000e+00> : vector<1xf32>
    %44 = vector.multi_reduction <add>, %43, %cst_14 [1, 2] : vector<1x128x1xf32> to vector<1xf32>
    %45 = vector.shape_cast %44 : vector<1xf32> to vector<1x1x1xf32>
    %46 = vector.extract %45[0, 0, 0] : f32 from vector<1x1x1xf32>
    %cst_15 = arith.constant 7.812500e-03 : f32
    %47 = arith.mulf %46, %cst_15 : f32
    %c0_16 = arith.constant 0 : index
    %c32 = arith.constant 32 : index
    %48 = vector.load %arg0[%c0_16, %c32] : memref<392x128xf32, #tpu.memory_space<vmem>>, vector<128x4xf32>
    %c0_17 = arith.constant 0 : index
    %c36 = arith.constant 36 : index
    %49 = vector.load %arg0[%c0_17, %c36] : memref<392x128xf32, #tpu.memory_space<vmem>>, vector<128x4xf32>
    %cst_18 = arith.constant dense<0.000000e+00> : vector<128x128xf32>
    %50 = tpu.matmul %48, %49, %cst_18 {dimension_numbers = #tpu.dot_dimension_numbers<[1], [1], [0], [0], [0, 0, 1, 0], [], []>} : vector<128x4xf32>, vector<128x4xf32>, vector<128x128xf32> -> vector<128x128xf32>
    %cst_19 = arith.constant 0.000000e+00 : f32
    %51 = vector.broadcast %cst_19 : f32 to vector<128x128xf32>
    %52 = arith.maximumf %50, %51 : vector<128x128xf32>
    %53 = math.sqrt %52 : vector<128x128xf32>
    %cst_20 = arith.constant dense<0xFF800000> : vector<128xf32>
    %54 = vector.multi_reduction <maximumf>, %53, %cst_20 [1] : vector<128x128xf32> to vector<128xf32>
    %55 = vector.shape_cast %54 : vector<128xf32> to vector<128x1xf32>
    %cst_21 = arith.constant dense<0xFF800000> : vector<1xf32>
    %56 = vector.multi_reduction <maximumf>, %55, %cst_21 [0] : vector<128x1xf32> to vector<1xf32>
    %57 = vector.shape_cast %56 : vector<1xf32> to vector<1x1xf32>
    %58 = tpu.reciprocal %57 {approx = true} : vector<1x1xf32> -> vector<1x1xf32>
    %59 = vector.broadcast %58 : vector<1x1xf32> to vector<128x128xf32>
    %60 = arith.mulf %53, %59 : vector<128x128xf32>
    %cst_22 = arith.constant 1.000000e+00 : f32
    %61 = vector.broadcast %cst_22 : f32 to vector<128x128xf32>
    %62 = arith.subf %61, %60 : vector<128x128xf32>
    %63 = arith.subf %13, %62 : vector<128x128xf32>
    %cst_23 = arith.constant 0.000000e+00 : f32
    %64 = vector.broadcast %cst_23 : f32 to vector<128x128xf32>
    %65 = arith.select %2, %63, %64 : vector<128x128xi1>, vector<128x128xf32>
    %66 = arith.mulf %65, %65 : vector<128x128xf32>
    %67 = vector.shape_cast %66 : vector<128x128xf32> to vector<1x128x128xf32>
    %cst_24 = arith.constant dense<0.000000e+00> : vector<1xf32>
    %68 = vector.multi_reduction <add>, %67, %cst_24 [1, 2] : vector<1x128x128xf32> to vector<1xf32>
    %69 = vector.shape_cast %68 : vector<1xf32> to vector<1x1x1xf32>
    %70 = vector.extract %69[0, 0, 0] : f32 from vector<1x1x1xf32>
    %cst_25 = arith.constant 6.10351563E-5 : f32
    %71 = arith.mulf %70, %cst_25 : f32
    %c136 = arith.constant 136 : index
    %c0_26 = arith.constant 0 : index
    %72 = vector.load %arg0[%c136, %c0_26] : memref<392x128xf32, #tpu.memory_space<vmem>>, vector<128x128xf32>
    %73 = arith.mulf %72, %72 : vector<128x128xf32>
    %cst_27 = arith.constant dense<0.000000e+00> : vector<128xf32>
    %74 = vector.multi_reduction <add>, %73, %cst_27 [1] : vector<128x128xf32> to vector<128xf32>
    %75 = vector.shape_cast %74 : vector<128xf32> to vector<128x1xf32>
    %cst_28 = arith.constant 1.000000e-24 : f32
    %76 = vector.broadcast %cst_28 : f32 to vector<128x1xf32>
    %77 = arith.maximumf %75, %76 : vector<128x1xf32>
    %78 = math.rsqrt %77 : vector<128x1xf32>
    %79 = vector.broadcast %78 : vector<128x1xf32> to vector<128x128xf32>
    %80 = arith.mulf %72, %79 : vector<128x128xf32>
    %81 = arith.truncf %80 : vector<128x128xf32> to vector<128x128xbf16>
    %c264 = arith.constant 264 : index
    %c0_29 = arith.constant 0 : index
    %82 = vector.load %arg0[%c264, %c0_29] : memref<392x128xf32, #tpu.memory_space<vmem>>, vector<128x128xf32>
    %83 = arith.truncf %82 : vector<128x128xf32> to vector<128x128xbf16>
    %cst_30 = arith.constant dense<0.000000e+00> : vector<128x128xf32>
    %84 = tpu.matmul %81, %83, %cst_30 {dimension_numbers = #tpu.dot_dimension_numbers<[1], [0], [0], [1], [0, 0, 1, 1], [], []>} : vector<128x128xbf16>, vector<128x128xbf16>, vector<128x128xf32> -> vector<128x128xf32>
    %85 = arith.truncf %84 : vector<128x128xf32> to vector<128x128xbf16>
    %cst_31 = arith.constant dense<0.000000e+00> : vector<128x128xf32>
    %86 = tpu.matmul %85, %81, %cst_31 {dimension_numbers = #tpu.dot_dimension_numbers<[1], [1], [0], [0], [0, 0, 1, 0], [], []>} : vector<128x128xbf16>, vector<128x128xbf16>, vector<128x128xf32> -> vector<128x128xf32>
    %cst_32 = arith.constant dense<0xFF800000> : vector<128xf32>
    %87 = vector.multi_reduction <maximumf>, %86, %cst_32 [1] : vector<128x128xf32> to vector<128xf32>
    %88 = vector.shape_cast %87 : vector<128xf32> to vector<128x1xf32>
    %cst_33 = arith.constant dense<0xFF800000> : vector<1xf32>
    %89 = vector.multi_reduction <maximumf>, %88, %cst_33 [0] : vector<128x1xf32> to vector<1xf32>
    %90 = vector.shape_cast %89 : vector<1xf32> to vector<1x1xf32>
    %91 = tpu.reciprocal %90 {approx = true} : vector<1x1xf32> -> vector<1x1xf32>
    %92 = vector.broadcast %91 : vector<1x1xf32> to vector<128x128xf32>
    %93 = arith.mulf %86, %92 : vector<128x128xf32>
    %94 = arith.subf %13, %93 : vector<128x128xf32>
    %cst_34 = arith.constant 0.000000e+00 : f32
    %95 = vector.broadcast %cst_34 : f32 to vector<128x128xf32>
    %96 = arith.select %2, %94, %95 : vector<128x128xi1>, vector<128x128xf32>
    %97 = arith.mulf %96, %96 : vector<128x128xf32>
    %98 = vector.shape_cast %97 : vector<128x128xf32> to vector<1x128x128xf32>
    %cst_35 = arith.constant dense<0.000000e+00> : vector<1xf32>
    %99 = vector.multi_reduction <add>, %98, %cst_35 [1, 2] : vector<1x128x128xf32> to vector<1xf32>
    %100 = vector.shape_cast %99 : vector<1xf32> to vector<1x1x1xf32>
    %101 = vector.extract %100[0, 0, 0] : f32 from vector<1x1x1xf32>
    %cst_36 = arith.constant 6.10351563E-5 : f32
    %102 = arith.mulf %101, %cst_36 : f32
    %c0_37 = arith.constant 0 : index
    %103 = memref.load %arg1[%c0_37] : memref<3xf32, #tpu.memory_space<smem>>
    memref.store %47, %arg1[%c0_37] : memref<3xf32, #tpu.memory_space<smem>>
    %c1 = arith.constant 1 : index
    %104 = memref.load %arg1[%c1] : memref<3xf32, #tpu.memory_space<smem>>
    memref.store %71, %arg1[%c1] : memref<3xf32, #tpu.memory_space<smem>>
    %c2 = arith.constant 2 : index
    %105 = memref.load %arg1[%c2] : memref<3xf32, #tpu.memory_space<smem>>
    memref.store %102, %arg1[%c2] : memref<3xf32, #tpu.memory_space<smem>>
    return
  }
}

</mosaic_0001>

<bundles_post_ra>
// kernel: tpu_custom_call.1
= control target key start
LH: loop header
LB: loop body
LE: loop exit
PB: predicated region body
PF: predicated region fallthrough
CT: control target
= control target key end

     0   :  { %6 = vsyncpa [#allocation3], 0  ;;  %s3867_s0 = inlined_call_operand.hbm [shape: f32[392,128], index: 0, kind: input, shape index: {}]   ;;  %s3868_s1 = inlined_call_operand.hbm [shape: f32[3], index: 1, kind: output, shape index: {}]  }
   0x1   :  { %7 = vsyncpa [#allocation4], 0  ;;  %s2392_s6 = smov [#allocation2]  }
   0x2   :  { %s13_s7 = sshll.u32 %s2392_s6, 4  ;;  %s14_s7 = int_to_ptr.vmem [resolvable:$true] %s13_s7 }
   0x3   :  { %s2368_s8 = scalar_lea.vmem %s14_s7, 6272  ;;  %p2373_p1 = scmp.lt.s32.totalorder %s14_s7, %s14_s7 }
   0x4   :  { %p2369_p0 = scmp.ne.s32.totalorder %s14_s7, %s2368_s8  ;;  %p2374_p2 = scmp.lt.s32.totalorder %s2368_s8, %s2368_s8 }
   0x6   :  { %p2375_p3 = por %p2374_p2, %p2373_p1 }
   0x8   :  { %p2376_p4 = pnand %p2375_p3, %p2369_p0 }
   0xa   :  { %2379 = shalt.err (!%p2376_p4)
}
   0xb   :  { %s2393_s9 = smov 128   ;;  %s2394_s10 = smov 8  }
   0xc   :  { %19 = dma.hbm_to_vmem [thread:$0]  %s3867_s0, 6272, %s14_s7, [#allocation3], %s2393_s9, %s2393_s9, %s2394_s10  }
   0xd   :  { %2388 = dma.done.wait [#allocation3], 6272  }
   0xe   :  { %2389 = vsyncadd [#allocation3], 4294961024  ;;  %v2413_v0 = vld [vmem:[#allocation2 + $0x70] sm:$0xff]  ;;  %vm91_vm0 = vcmask 261120   ;;  %v2415_v1 = vld [vmem:[#allocation2 + $0x78] sm:$0xff]  ;;  %s2395_s0 = smov 92  }
   0xf   :  { %v2417_v2 = vld [vmem:[#allocation2 + $0x60] sm:$0xff]  ;;  %v89_v3 = vmul.f32 %v2413_v0, %v2413_v0  ;;  %v90_v4 = vmul.f32 %v2415_v1, %v2415_v1  ;;  %v2425_v6 = vld [vmem:[#allocation2 + $0x68] sm:$0xff]  ;;  %v2429_v8 = vld [vmem:[#allocation2 + $0x50] sm:$0xff]  ;;  %s2396_s13 = smov 96   ;;  %vm844_vm1 = vcmask 31744   ;;  %s2399_s20 = smov [#allocation5]  }
  0x10   :  { %v87_v5 = vmul.f32 %v2417_v2, %v2417_v2  ;;  %v88_v7 = vmul.f32 %v2425_v6, %v2425_v6  ;;  %v2431_v9 = vld [vmem:[#allocation2 + $0x58] sm:$0xff]  ;;  %v85_v14 = vmul.f32 %v2429_v8, %v2429_v8  ;;  %v2441_v16 = vld [vmem:[#allocation2 + $0x40] sm:$0xff]  ;;  %v2443_v17 = vld [vmem:[#allocation2 + $0x48] sm:$0xff] }
  0x11   :  { %v134_v10 = vsel %vm91_vm0, %v89_v3, 0.0  ;;  %v137_v12 = vsel %vm91_vm0, %v90_v4, 0.0  ;;  %v86_v15 = vmul.f32 %v2431_v9, %v2431_v9  ;;  %v83_v20 = vmul.f32 %v2441_v16, %v2441_v16  ;;  %v2451_v22 = vld [vmem:[#allocation2 + $0x30] sm:$0xff]  ;;  %v2453_v23 = vld [vmem:[#allocation2 + $0x38] sm:$0xff]  ;;  %v2461_v28 = vld [vmem:[#allocation2 + $0x20] sm:$0xff] }
  0x12   :  { %v128_v11 = vsel %vm91_vm0, %v87_v5, 0.0  ;;  %135 = vadd.xlane.f32.xlu0 %v134_v10  ;;  %v131_v13 = vsel %vm91_vm0, %v88_v7, 0.0  ;;  %v122_v18 = vsel %vm91_vm0, %v85_v14, 0.0  ;;  %v84_v21 = vmul.f32 %v2443_v17, %v2443_v17  ;;  %v2463_v29 = vld [vmem:[#allocation2 + $0x28] sm:$0xff]  ;;  %v2471_v34 = vld [vmem:[#allocation2 + $0x10] sm:$0xff]  ;;  %v2473_v35 = vld [vmem:[#allocation2 + $0x18] sm:$0xff] }
  0x13   :  { %129 = vadd.xlane.f32.xlu1 %v128_v11  ;;  %v125_v19 = vsel %vm91_vm0, %v86_v15, 0.0  ;;  %v116_v24 = vsel %vm91_vm0, %v83_v20, 0.0  ;;  %v81_v26 = vmul.f32 %v2451_v22, %v2451_v22  ;;  %v82_v27 = vmul.f32 %v2453_v23, %v2453_v23  ;;  %v2481_v40 = vld [vmem:[#allocation2] sm:$0xff]  ;;  %v2483_v41 = vld [vmem:[#allocation2 + $0x8] sm:$0xff]  ;;  %v2495_v49 = vld [vmem:[#allocation2 + $0x90] sm:$0xff] }
  0x14   :  { %v119_v25 = vsel %vm91_vm0, %v84_v21, 0.0  ;;  %v79_v32 = vmul.f32 %v2461_v28, %v2461_v28  ;;  %v80_v33 = vmul.f32 %v2463_v29, %v2463_v29  ;;  %v77_v38 = vmul.f32 %v2471_v34, %v2471_v34  ;;  %v2493_v48 = vld [vmem:[#allocation2 + $0x88] sm:$0xff]  ;;  %v2501_v52 = vld [vmem:[#allocation2 + $0x98] sm:$0xff]  ;;  %v2503_v53 = vld [vmem:[#allocation2 + $0xa0] sm:$0xff] }
  0x15   :  { %v110_v30 = vsel %vm91_vm0, %v81_v26, 0.0  ;;  %v113_v31 = vsel %vm91_vm0, %v82_v27, 0.0  ;;  %v78_v39 = vmul.f32 %v2473_v35, %v2473_v35  ;;  %v75_v44 = vmul.f32 %v2481_v40, %v2481_v40  ;;  %v2509_v56 = vld [vmem:[#allocation2 + $0xa8] sm:$0xff]  ;;  %v2511_v57 = vld [vmem:[#allocation2 + $0xb0] sm:$0xff]  ;;  %v2517_v60 = vld [vmem:[#allocation2 + $0xb8] sm:$0xff] }
  0x16   :  { %138 = vadd.xlane.f32.xlu0 %v137_v12  ;;  %v104_v36 = vsel %vm91_vm0, %v79_v32, 0.0  ;;  %v107_v37 = vsel %vm91_vm0, %v80_v33, 0.0  ;;  %v98_v42 = vsel %vm91_vm0, %v77_v38, 0.0  ;;  %v76_v45 = vmul.f32 %v2483_v41, %v2483_v41  ;;  %v2519_v61 = vld [vmem:[#allocation2 + $0xc0] sm:$0xff]  ;;  %v2525_v3 = vld [vmem:[#allocation2 + $0xc8] sm:$0xff]  ;;  %v2527_v4 = vld [vmem:[#allocation2 + $0xd0] sm:$0xff] }
  0x17   :  { %132 = vadd.xlane.f32.xlu1 %v131_v13  ;;  %v101_v43 = vsel %vm91_vm0, %v78_v39, 0.0  ;;  %v92_v46 = vsel %vm91_vm0, %v75_v44, 0.0  ;;  %v1357_v50 = vmul.f32 %v2493_v48, %v2493_v48  ;;  %v1358_v51 = vmul.f32 %v2495_v49, %v2495_v49  ;;  %v2533_v10 = vld [vmem:[#allocation2 + $0xd8] sm:$0xff]  ;;  %v2535_v11 = vld [vmem:[#allocation2 + $0xe0] sm:$0xff]  ;;  %v2541_v14 = vld [vmem:[#allocation2 + $0xe8] sm:$0xff] }
  0x18   :  { %v95_v47 = vsel %vm91_vm0, %v76_v45, 0.0  ;;  %v1359_v54 = vmul.f32 %v2501_v52, %v2501_v52  ;;  %v1360_v55 = vmul.f32 %v2503_v53, %v2503_v53  ;;  %v1361_v58 = vmul.f32 %v2509_v56, %v2509_v56  ;;  %v2543_v15 = vld [vmem:[#allocation2 + $0xf0] sm:$0xff]  ;;  %v2549_v20 = vld [vmem:[#allocation2 + $0xf8] sm:$0xff]  ;;  %v2551_v21 = vld [vmem:[#allocation2 + $0x100] sm:$0xff] }
  0x19   :  { %v1362_v59 = vmul.f32 %v2511_v57, %v2511_v57  ;;  %v1363_v62 = vmul.f32 %v2517_v60, %v2517_v60  ;;  %v1364_v63 = vmul.f32 %v2519_v61, %v2519_v61  ;;  %v1365_v5 = vmul.f32 %v2525_v3, %v2525_v3 }
  0x1a   :  { %123 = vadd.xlane.f32.xlu0 %v122_v18  ;;  %v1366_v7 = vmul.f32 %v2527_v4, %v2527_v4  ;;  %v1367_v12 = vmul.f32 %v2533_v10, %v2533_v10  ;;  %v1368_v13 = vmul.f32 %v2535_v11, %v2535_v11  ;;  %v1369_v18 = vmul.f32 %v2541_v14, %v2541_v14 }
  0x1b   :  { %126 = vadd.xlane.f32.xlu1 %v125_v19  ;;  %v1370_v19 = vmul.f32 %v2543_v15, %v2543_v15 }
  0x1e   :  { %117 = vadd.xlane.f32.xlu0 %v116_v24  ;;  %v1371_v24 = vmul.f32 %v2549_v20, %v2549_v20 }
  0x1f   :  { %120 = vadd.xlane.f32.xlu1 %v119_v25  ;;  %v1372_v25 = vmul.f32 %v2551_v21, %v2551_v21 }
  0x22   :  { %111 = vadd.xlane.f32.xlu0 %v110_v30 }
  0x23   :  { %114 = vadd.xlane.f32.xlu1 %v113_v31 }
  0x26   :  { %105 = vadd.xlane.f32.xlu0 %v104_v36 }
  0x27   :  { %108 = vadd.xlane.f32.xlu1 %v107_v37 }
  0x2a   :  { %99 = vadd.xlane.f32.xlu0 %v98_v42 }
  0x2b   :  { %102 = vadd.xlane.f32.xlu1 %v101_v43 }
  0x2e   :  { %93 = vadd.xlane.f32.xlu0 %v92_v46 }
  0x2f   :  { %96 = vadd.xlane.f32.xlu1 %v95_v47 }
  0x32   :  { %1373 = vadd.xlane.f32.xlu0 %v1357_v50 }
  0x33   :  { %1375 = vadd.xlane.f32.xlu1 %v1358_v51 }
  0x36   :  { %1377 = vadd.xlane.f32.xlu0 %v1359_v54 }
  0x37   :  { %1379 = vadd.xlane.f32.xlu1 %v1360_v55 }
  0x3a   :  { %1381 = vadd.xlane.f32.xlu0 %v1361_v58 }
  0x3b   :  { %1383 = vadd.xlane.f32.xlu1 %v1362_v59 }
  0x3e   :  { %1385 = vadd.xlane.f32.xlu0 %v1363_v62 }
  0x3f   :  { %1387 = vadd.xlane.f32.xlu1 %v1364_v63 }
  0x42   :  { %1389 = vadd.xlane.f32.xlu0 %v1365_v5 }
  0x43   :  { %1391 = vadd.xlane.f32.xlu1 %v1366_v7 }
  0x46   :  { %1393 = vadd.xlane.f32.xlu0 %v1367_v12 }
  0x47   :  { %1395 = vadd.xlane.f32.xlu1 %v1368_v13 }
  0x4a   :  { %1397 = vadd.xlane.f32.xlu0 %v1369_v18 }
  0x4b   :  { %1399 = vadd.xlane.f32.xlu1 %v1370_v19 }
  0x4e   :  { %1401 = vadd.xlane.f32.xlu0 %v1371_v24 }
  0x4f   :  { %1403 = vadd.xlane.f32.xlu1 %v1372_v25 }
  0x60   :  { %840 = vrot.lane.b32.xlu1 %v2413_v0, %s2395_s0 }
  0x64   :  { %838 = vrot.lane.b32.xlu1 %v2425_v6, %s2395_s0  ;;  %842 = vrot.lane.b32.xlu0 %v2415_v1, %s2395_s0 }
  0x68   :  { %836 = vrot.lane.b32.xlu1 %v2417_v2, %s2395_s0  ;;  %834 = vrot.lane.b32.xlu0 %v2431_v9, %s2395_s0 }
  0x6c   :  { %832 = vrot.lane.b32.xlu1 %v2429_v8, %s2395_s0  ;;  %830 = vrot.lane.b32.xlu0 %v2443_v17, %s2395_s0 }
  0x70   :  { %828 = vrot.lane.b32.xlu1 %v2441_v16, %s2395_s0  ;;  %826 = vrot.lane.b32.xlu0 %v2453_v23, %s2395_s0 }
  0x74   :  { %824 = vrot.lane.b32.xlu1 %v2451_v22, %s2395_s0  ;;  %822 = vrot.lane.b32.xlu0 %v2463_v29, %s2395_s0 }
  0x78   :  { %820 = vrot.lane.b32.xlu1 %v2461_v28, %s2395_s0  ;;  %818 = vrot.lane.b32.xlu0 %v2473_v35, %s2395_s0 }
  0x7c   :  { %816 = vrot.lane.b32.xlu1 %v2471_v34, %s2395_s0  ;;  %814 = vrot.lane.b32.xlu0 %v2483_v41, %s2395_s0 }
  0x80   :  { %812 = vrot.lane.b32.xlu1 %v2481_v40, %s2395_s0  ;;  %780 = vrot.lane.b32.xlu0 %v2481_v40, %s2396_s13 }
  0x84   :  { %782 = vrot.lane.b32.xlu1 %v2483_v41, %s2396_s13  ;;  %784 = vrot.lane.b32.xlu0 %v2471_v34, %s2396_s13 }
  0x88   :  { %786 = vrot.lane.b32.xlu1 %v2473_v35, %s2396_s13  ;;  %788 = vrot.lane.b32.xlu0 %v2461_v28, %s2396_s13 }
  0x8c   :  { %790 = vrot.lane.b32.xlu1 %v2463_v29, %s2396_s13  ;;  %792 = vrot.lane.b32.xlu0 %v2451_v22, %s2396_s13 }
  0x90   :  { %794 = vrot.lane.b32.xlu1 %v2453_v23, %s2396_s13  ;;  %796 = vrot.lane.b32.xlu0 %v2441_v16, %s2396_s13 }
  0x94   :  { %798 = vrot.lane.b32.xlu1 %v2443_v17, %s2396_s13  ;;  %800 = vrot.lane.b32.xlu0 %v2429_v8, %s2396_s13 }
  0x98   :  { %802 = vrot.lane.b32.xlu1 %v2431_v9, %s2396_s13  ;;  %804 = vrot.lane.b32.xlu0 %v2417_v2, %s2396_s13 }
  0x9b   :  { %v136_v26 = vpop.xlane.xlu0 %135 }
  0x9c   :  { %v130_v27 = vpop.xlane.xlu1 %129  ;;  %806 = vrot.lane.b32.xlu1 %v2425_v6, %s2396_s13  ;;  %v154_v30 = vmax.f32 %v136_v26, 1e-24  ;;  %808 = vrot.lane.b32.xlu0 %v2413_v0, %s2396_s13 }
  0x9d   :  { %v152_v31 = vmax.f32 %v130_v27, 1e-24 }
  0x9f   :  { %v139_v32 = vpop.xlane.xlu0 %138  ;;  %2163 = vrsqrt.f32 %v152_v31 }
  0xa0   :  { %v133_v33 = vpop.xlane.xlu1 %132  ;;  %810 = vrot.lane.b32.xlu1 %v2415_v1, %s2396_s13  ;;  %2165 = vrsqrt.f32 %v154_v30  ;;  %v155_v36 = vmax.f32 %v139_v32, 1e-24 }
  0xa1   :  { %v153_v37 = vmax.f32 %v133_v33, 1e-24 }
  0xa2   :  { %2167 = vrsqrt.f32 %v155_v36 }
  0xa3   :  { %2169 = vrsqrt.f32 %v153_v37  ;;  %v124_v38 = vpop.xlane.xlu0 %123  ;;  %v2397_v37 = vmov 40  }
  0xa4   :  { %v127_v39 = vpop.xlane.xlu1 %126  ;;  %v150_v42 = vmax.f32 %v124_v38, 1e-24  ;;  %2162 = vset.pattern.permute.xlu1 %v2397_v37  ;;  %2161 = vset.pattern.permute.xlu0 %v2397_v37 }
  0xa5   :  { %v151_v43 = vmax.f32 %v127_v39, 1e-24  ;;  %325 = vperm.xlu1 %2162, %v2483_v41   ;;  %320 = vperm.xlu0 %2161, %v2481_v40  }
  0xa6   :  { %2171 = vrsqrt.f32 %v150_v42 }
  0xa7   :  { %2173 = vrsqrt.f32 %v151_v43  ;;  %v118_v44 = vpop.xlane.xlu0 %117 }
  0xa8   :  { %v121_v45 = vpop.xlane.xlu1 %120  ;;  %v148_v46 = vmax.f32 %v118_v44, 1e-24 }
  0xa9   :  { %v149_v47 = vmax.f32 %v121_v45, 1e-24  ;;  %330 = vperm.xlu1 %2162, %v2471_v34   ;;  %335 = vperm.xlu0 %2161, %v2473_v35  }
  0xaa   :  { %2175 = vrsqrt.f32 %v148_v46 }
  0xab   :  { %v112_v50 = vpop.xlane.xlu0 %111  ;;  %2177 = vrsqrt.f32 %v149_v47 }
  0xac   :  { %v115_v51 = vpop.xlane.xlu1 %114  ;;  %v2164_v54 = vpop.eup %2163  ;;  %v146_v13 = vmax.f32 %v112_v50, 1e-24 }
  0xad   :  { %v2166_v55 = vpop.eup %2165  ;;  %v184_v63 = vmul.f32 %v2164_v54, %v2417_v2  ;;  %v147_v19 = vmax.f32 %v115_v51, 1e-24  ;;  %340 = vperm.xlu1 %2162, %v2461_v28   ;;  %345 = vperm.xlu0 %2161, %v2463_v29  }
  0xae   :  { %v186_v7 = vmul.f32 %v2166_v55, %v2413_v0  ;;  %2179 = vrsqrt.f32 %v146_v13 }
  0xaf   :  { %v2168_v58 = vpop.eup %2167  ;;  %v106_v59 = vpop.xlane.xlu0 %105  ;;  %2181 = vrsqrt.f32 %v147_v19 }
  0xb0   :  { %v109_v62 = vpop.xlane.xlu1 %108  ;;  %v2170_v5 = vpop.eup %2169  ;;  %v187_v12 = vmul.f32 %v2168_v58, %v2415_v1  ;;  %v144_v44 = vmax.f32 %v106_v59, 1e-24 }
  0xb1   :  { %v185_v18 = vmul.f32 %v2170_v5, %v2425_v6  ;;  %v145_v46 = vmax.f32 %v109_v62, 1e-24  ;;  %350 = vperm.xlu1 %2162, %v2451_v22   ;;  %355 = vperm.xlu0 %2161, %v2453_v23  }
  0xb2   :  { %v2593_v24 = vpack.c.bf16 %v187_v12, %v186_v7 }
  0xb3   :  { %v2172_v25 = vpop.eup %2171  ;;  %v100_v26 = vpop.xlane.xlu0 %99  ;;  %v2595_v30 = vpack.c.bf16 %v185_v18, %v184_v63 }
  0xb4   :  { %v103_v27 = vpop.xlane.xlu1 %102  ;;  %v2174_v31 = vpop.eup %2173  ;;  %2139 = vmatprep.subr.msk.bf16.mxu0 %vm91_vm0, %v2593_v24  ;;  %v218_v32 = vsel %vm91_vm0, %v2593_v24, 0  ;;  %v182_v33 = vmul.f32 %v2172_v25, %v2429_v8  ;;  %v142_v5 = vmax.f32 %v100_v26, 1e-24 }
  0xb5   :  { %1988 = vmatpush3.bf16.xpose.msra.mxu0 %v218_v32  ;;  %v183_v36 = vmul.f32 %v2174_v31, %v2431_v9  ;;  %v215_v55 = vsel %vm91_vm0, %v2595_v30, 0  ;;  %v143_v12 = vmax.f32 %v103_v27, 1e-24  ;;  %360 = vperm.xlu1 %2162, %v2441_v16  }
  0xb6   :  { %2140 = vmatprep.subr.msk.bf16.mxu0 %vm91_vm0, %v2595_v30  ;;  %365 = vperm.xlu0 %2161, %v2443_v17  }
  0xb7   :  { %v94_v38 = vpop.xlane.xlu0 %93  ;;  %v2176_v45 = vpop.eup %2175  ;;  %v2607_v47 = vpack.c.bf16 %v183_v36, %v182_v33 }
  0xb8   :  { %v97_v39 = vpop.xlane.xlu1 %96  ;;  %v140_v42 = vmax.f32 %v94_v38, 1e-24  ;;  %v2178_v50 = vpop.eup %2177  ;;  %v180_v58 = vmul.f32 %v2176_v45, %v2441_v16 }
  0xb9   :  { %v141_v43 = vmax.f32 %v97_v39, 1e-24  ;;  %v181_v59 = vmul.f32 %v2178_v50, %v2443_v17  ;;  %v212_v13 = vsel %vm91_vm0, %v2607_v47, 0  ;;  %370 = vperm.xlu1 %2162, %v2429_v8  }
  0xba   :  { %2183 = vrsqrt.f32 %v140_v42  ;;  %375 = vperm.xlu0 %2161, %v2431_v9  }
  0xbb   :  { %2185 = vrsqrt.f32 %v141_v43  ;;  %v2609_v51 = vpop.xlane.xlu0 %1373  ;;  %v2180_v7 = vpop.eup %2179  ;;  %v2629_v18 = vpack.c.bf16 %v181_v59, %v180_v58 }
  0xbc   :  { %v2611_v54 = vpop.xlane.xlu1 %1375  ;;  %2187 = vrsqrt.f32 %v144_v44  ;;  %v2182_v19 = vpop.eup %2181  ;;  %v178_v26 = vmul.f32 %v2180_v7, %v2451_v22 }
  0xbd   :  { %1990 = vmatpush3.bf16.xpose.msra.mxu0 %v215_v55  ;;  %2189 = vrsqrt.f32 %v145_v46  ;;  %v179_v27 = vmul.f32 %v2182_v19, %v2453_v23  ;;  %v209_v22 = vsel %vm91_vm0, %v2629_v18, 0  ;;  %380 = vperm.xlu1 %2162, %v2417_v2  }
  0xbe   :  { %2141 = vmatprep.subr.msk.bf16.mxu0 %vm91_vm0, %v2607_v47  ;;  %2191 = vrsqrt.f32 %v142_v5  ;;  %385 = vperm.xlu0 %2161, %v2425_v6  }
  0xbf   :  { %v2621_v62 = vpop.xlane.xlu0 %1377  ;;  %2193 = vrsqrt.f32 %v143_v12  ;;  %v2651_v43 = vpack.c.bf16 %v179_v27, %v178_v26  ;;  %v1475_v26 = vld [vmem:[#allocation2 + $0x178] sm:$0xff]  ;;  %v1476_v27 = vld [vmem:[#allocation2 + $0x180] sm:$0xff] }
  0xc0   :  { %v2623_v63 = vpop.xlane.xlu1 %1379 }
  0xc1   :  { %v206_v9 = vsel %vm91_vm0, %v2651_v43, 0  ;;  %390 = vperm.xlu1 %2162, %v2413_v0  }
  0xc2   :  { %395 = vperm.xlu0 %2161, %v2415_v1  }
  0xc3   :  { %v2631_v25 = vpop.xlane.xlu0 %1381 }
  0xc4   :  { %v2633_v31 = vpop.xlane.xlu1 %1383 }
  0xc5   :  { %1992 = vmatpush3.bf16.xpose.msra.mxu0 %v212_v13 }
  0xc6   :  { %2142 = vmatprep.subr.msk.bf16.mxu0 %vm91_vm0, %v2629_v18 }
  0xc7   :  { %v2184_v32 = vpop.eup %2183  ;;  %v2641_v33 = vpop.xlane.xlu0 %1385 }
  0xc8   :  { %v2643_v36 = vpop.xlane.xlu1 %1387  ;;  %v2186_v37 = vpop.eup %2185  ;;  %v172_v38 = vmul.f32 %v2184_v32, %v2481_v40 }
  0xc9   :  { %v173_v39 = vmul.f32 %v2186_v37, %v2483_v41  ;;  %v2188_v42 = vpop.eup %2187 }
  0xca   :  { %v2190_v23 = vpop.eup %2189  ;;  %v176_v16 = vmul.f32 %v2188_v42, %v2461_v28 }
  0xcb   :  { %v2653_v44 = vpop.xlane.xlu0 %1389  ;;  %v188_v46 = vpack.c.bf16 %v173_v39, %v172_v38  ;;  %v177_v17 = vmul.f32 %v2190_v23, %v2463_v29  ;;  %v2192_v8 = vpop.eup %2191  ;;  %v1484_v39 = vpack.c.bf16 %v1476_v27, %v1475_v26 }
  0xcc   :  { %v2655_v45 = vpop.xlane.xlu1 %1391  ;;  %v2194_v55 = vpop.eup %2193  ;;  %v174_v2 = vmul.f32 %v2192_v8, %v2471_v34  ;;  %v1474_v8 = vld [vmem:[#allocation2 + $0x170] sm:$0xff] }
  0xcd   :  { %1994 = vmatpush3.bf16.xpose.msra.mxu0 %v209_v22  ;;  %2003 = vmatprep.mubr.msk.bf16.mxu0 %vm91_vm0, %v188_v46  ;;  %v190_v50 = vpack.c.bf16 %v177_v17, %v176_v16  ;;  %v175_v6 = vmul.f32 %v2194_v55, %v2473_v35  ;;  %v197_v37 = vsel %vm91_vm0, %v188_v46, 0  ;;  %v1405_v16 = vmax.f32 %v2609_v51, 1e-24  ;;  %v1473_v17 = vld [vmem:[#allocation2 + $0x168] sm:$0xff] }
  0xce   :  { %2143 = vmatprep.subr.msk.bf16.mxu0 %vm91_vm0, %v2651_v43  ;;  %v1483_v55 = vpack.c.bf16 %v1474_v8, %v1473_v17 }
  0xcf   :  { %v2664_v40 = vpop.xlane.xlu0 %1393  ;;  %v203_v5 = vsel %vm91_vm0, %v190_v50, 0  ;;  %v189_v7 = vpack.c.bf16 %v175_v6, %v174_v2  ;;  %2195 = vrsqrt.f32 %v1405_v16  ;;  %v1471_v6 = vld [vmem:[#allocation2 + $0x158] sm:$0xff] }
  0xd0   :  { %v2666_v41 = vpop.xlane.xlu1 %1395  ;;  %v1415_v8 = vmax.f32 %v2664_v40, 1e-24 }
  0xd1   :  { %v200_v34 = vsel %vm91_vm0, %v189_v7, 0 }
  0xd3   :  { %v2672_v58 = vpop.xlane.xlu0 %1397 }
  0xd4   :  { %v2674_v59 = vpop.xlane.xlu1 %1399 }
  0xd5   :  { %1996 = vmatpush3.bf16.xpose.msra.mxu0 %v206_v9  ;;  %v1406_v9 = vmax.f32 %v2611_v54, 1e-24  ;;  %v1407_v54 = vmax.f32 %v2621_v62, 1e-24 }
  0xd6   :  { %2144 = vmatprep.subr.msk.bf16.mxu0 %vm91_vm0, %v190_v50 }
  0xd7   :  { %v2681_v28 = vpop.xlane.xlu0 %1401  ;;  %2197 = vrsqrt.f32 %v1406_v9  ;;  %v1461_v9 = vld [vmem:[#allocation2 + $0x108] sm:$0xff] }
  0xd8   :  { %v2683_v29 = vpop.xlane.xlu1 %1403  ;;  %2199 = vrsqrt.f32 %v1407_v54  ;;  %v1419_v26 = vmax.f32 %v2681_v28, 1e-24  ;;  %v1413_v28 = vmax.f32 %v2653_v44, 1e-24 }
  0xdb   :  { %v843_v12 = vpop.permute.xlu0 %842 }
  0xdc   :  { %v841_v13 = vpop.permute.xlu1 %840  ;;  %2019 = vmatprep.subr.msk.mxu1 %vm844_vm1, %v843_v12 }
  0xdd   :  { %1998 = vmatpush3.bf16.xpose.msra.mxu0 %v203_v5  ;;  %2020 = vmatpush3.xpose.msk.msra.mxu1 %vm844_vm1, %v843_v12  ;;  %v1472_v5 = vld [vmem:[#allocation2 + $0x160] sm:$0xff] }
  0xde   :  { %2021 = vmatprep.subr.msk.mxu1 %vm844_vm1, %v841_v13  ;;  %2145 = vmatprep.subr.msk.bf16.mxu0 %vm91_vm0, %v189_v7  ;;  %v1482_v12 = vpack.c.bf16 %v1472_v5, %v1471_v6 }
  0xdf   :  { %v835_v1 = vpop.permute.xlu0 %834 }
  0xe0   :  { %v839_v0 = vpop.permute.xlu1 %838 }
  0xe1   :  { %2022 = vmatpush3.xpose.msk.msra.mxu1 %vm844_vm1, %v841_v13 }
  0xe2   :  { %2023 = vmatprep.subr.msk.mxu1 %vm844_vm1, %v839_v0 }
  0xe3   :  { %v831_v19 = vpop.permute.xlu0 %830 }
  0xe4   :  { %v837_v35 = vpop.permute.xlu1 %836 }
  0xe5   :  { %2000 = vmatpush3.bf16.xpose.msra.mxu0 %v200_v34  ;;  %2024 = vmatpush3.xpose.msk.msra.mxu1 %vm844_vm1, %v839_v0  ;;  %v1408_v0 = vmax.f32 %v2623_v63, 1e-24  ;;  %v1410_v34 = vmax.f32 %v2633_v31, 1e-24  ;;  %v1411_v63 = vmax.f32 %v2641_v33, 1e-24 }
  0xe6   :  { %2025 = vmatprep.subr.msk.mxu1 %vm844_vm1, %v837_v35  ;;  %2146 = vmatprep.subr.msk.bf16.mxu0 %vm91_vm0, %v188_v46  ;;  %v1420_v31 = vmax.f32 %v2683_v29, 1e-24 }
  0xe7   :  { %v827_v32 = vpop.permute.xlu0 %826  ;;  %2201 = vrsqrt.f32 %v1408_v0 }
  0xe8   :  { %v833_v38 = vpop.permute.xlu1 %832 }
  0xe9   :  { %2026 = vmatpush3.xpose.msk.msra.mxu1 %vm844_vm1, %v837_v35 }
  0xea   :  { %2027 = vmatprep.subr.msk.mxu1 %vm844_vm1, %v835_v1 }
  0xeb   :  { %v2699_v42 = vpop.permute.xlu0 %822 }
  0xec   :  { %v829_v22 = vpop.permute.xlu1 %828 }
  0xed   :  { %2002 = vmatpush3.bf16.xpose.msra.mxu0 %v197_v37  ;;  %2028 = vmatpush3.xpose.msk.msra.mxu1 %vm844_vm1, %v835_v1  ;;  %v1470_v1 = vld [vmem:[#allocation2 + $0x150] sm:$0xff]  ;;  %v1465_v37 = vld [vmem:[#allocation2 + $0x128] sm:$0xff] }
  0xee   :  { %2029 = vmatprep.subr.msk.mxu1 %vm844_vm1, %v833_v38  ;;  %2075 = vmatprep.subr.bf16.mxu0 %v1484_v39 }
  0xef   :  { %v2703_v23 = vpop.permute.xlu0 %818 }
  0xf0   :  { %v825_v46 = vpop.permute.xlu1 %824 }
  0xf1   :  { %2030 = vmatpush3.xpose.msk.msra.mxu1 %vm844_vm1, %v833_v38  ;;  %v1466_v38 = vld [vmem:[#allocation2 + $0x130] sm:$0xff] }
  0xf2   :  { %2031 = vmatprep.subr.msk.mxu1 %vm844_vm1, %v831_v19  ;;  %v1479_v44 = vpack.c.bf16 %v1466_v38, %v1465_v37 }
  0xf3   :  { %v2709_v2 = vpop.permute.xlu0 %814 }
  0xf4   :  { %2004 = vmatmul.mubr.msk.bf16.vlgmr.msra.gmra.mxu0 %vm91_vm0, %v189_v7  ;;  %v2715_v51 = vpop.permute.xlu1 %820  ;;  %v1469_v7 = vld [vmem:[#allocation2 + $0x148] sm:$0xff] }
  0xf5   :  { %2007 = vmatprep.mubr.msk.bf16.mxu0 %vm91_vm0, %v190_v50  ;;  %2032 = vmatpush3.xpose.msk.msra.mxu1 %vm844_vm1, %v831_v19  ;;  %v1409_v50 = vmax.f32 %v2631_v25, 1e-24  ;;  %v1481_v62 = vpack.c.bf16 %v1470_v1, %v1469_v7  ;;  %v1467_v19 = vld [vmem:[#allocation2 + $0x138] sm:$0xff]  ;;  %v1468_v25 = vld [vmem:[#allocation2 + $0x140] sm:$0xff] }
  0xf6   :  { %2076 = vmatpush3.bf16.msra.mxu0 %v1484_v39  ;;  %2033 = vmatprep.subr.msk.mxu1 %vm844_vm1, %v829_v22  ;;  %v1480_v27 = vpack.c.bf16 %v1468_v25, %v1467_v19  ;;  %v1417_v39 = vmax.f32 %v2672_v58, 1e-24 }
  0xf7   :  { %2077 = vmatprep.subr.bf16.mxu0 %v1483_v55  ;;  %v781_v13 = vpop.permute.xlu0 %780  ;;  %2203 = vrsqrt.f32 %v1409_v50 }
  0xf8   :  { %2051 = vmatprep.mubr.msk.f32.mxu1 %vm844_vm1, %v781_v13  ;;  %v2724_v35 = vpop.permute.xlu1 %816  ;;  %2205 = vrsqrt.f32 %v1410_v34 }
  0xf9   :  { %2034 = vmatpush3.xpose.msk.msra.mxu1 %vm844_vm1, %v829_v22  ;;  %2207 = vrsqrt.f32 %v1411_v63  ;;  %v1464_v22 = vld [vmem:[#allocation2 + $0x120] sm:$0xff] }
  0xfa   :  { %2078 = vmatpush3.bf16.msra.mxu0 %v1483_v55  ;;  %2035 = vmatprep.subr.msk.mxu1 %vm844_vm1, %v827_v32  ;;  %2209 = vrsqrt.f32 %v1419_v26 }
  0xfb   :  { %2079 = vmatprep.subr.bf16.mxu0 %v1482_v12  ;;  %2211 = vrsqrt.f32 %v1420_v31  ;;  %v785_v13 = vpop.permute.xlu0 %784 }
  0xfc   :  { %2008 = vmatmul.mubr.msk.bf16.gmra.mxu0 %vm91_vm0, %v2651_v43  ;;  %v2735_v33 = vpop.permute.xlu1 %812  ;;  %v1412_v43 = vmax.f32 %v2643_v36, 1e-24  ;;  %v1418_v36 = vmax.f32 %v2674_v59, 1e-24 }
  0xfd   :  { %2011 = vmatprep.mubr.msk.bf16.mxu0 %vm91_vm0, %v2629_v18  ;;  %2036 = vmatpush3.xpose.msk.msra.mxu1 %vm844_vm1, %v827_v32  ;;  %v2196_v18 = vpop.eup %2195  ;;  %v1414_v32 = vmax.f32 %v2655_v45, 1e-24  ;;  %v1463_v45 = vld [vmem:[#allocation2 + $0x118] sm:$0xff] }
  0xfe   :  { %2080 = vmatpush3.bf16.msra.mxu0 %v1482_v12  ;;  %2037 = vmatprep.subr.msk.mxu1 %vm844_vm1, %v825_v46  ;;  %v2198_v29 = vpop.eup %2197  ;;  %2213 = vrsqrt.f32 %v1412_v43  ;;  %v1437_v58 = vmul.f32 %v2196_v18, %v2493_v48 }
  0xff   :  { %2081 = vmatprep.subr.bf16.mxu0 %v1481_v62  ;;  %2215 = vrsqrt.f32 %v1413_v28  ;;  %v1438_v59 = vmul.f32 %v2198_v29, %v2495_v49  ;;  %v2200_v17 = vpop.eup %2199  ;;  %v789_v63 = vpop.permute.xlu0 %788 }
 0x100   :  { %v2747_v16 = vpop.permute.xlu1 %782  ;;  %2217 = vrsqrt.f32 %v1414_v32  ;;  %v1439_v5 = vmul.f32 %v2200_v17, %v2501_v52 }
 0x101   :  { %2038 = vmatpush3.xpose.msk.msra.mxu1 %vm844_vm1, %v825_v46  ;;  %2219 = vrsqrt.f32 %v1417_v39  ;;  %v2202_v46 = vpop.eup %2201  ;;  %v2761_v48 = vpack.c.bf16 %v1438_v59, %v1437_v58 }
 0x102   :  { %2082 = vmatpush3.bf16.msra.mxu0 %v1481_v62  ;;  %2039 = vmatprep.subr.msk.mxu1 %vm844_vm1, %v2699_v42  ;;  %2221 = vrsqrt.f32 %v1418_v36 }
 0x103   :  { %2083 = vmatprep.subr.bf16.mxu0 %v1480_v27  ;;  %2223 = vrsqrt.f32 %v1415_v8  ;;  %v793_v28 = vpop.permute.xlu0 %792 }
 0x104   :  { %2012 = vmatmul.mubr.msk.bf16.gmra.mxu0 %vm91_vm0, %v2607_v47  ;;  %v1478_v47 = vpack.c.bf16 %v1464_v22, %v1463_v45  ;;  %v2204_v49 = vpop.eup %2203  ;;  %v2765_v55 = vpop.permute.xlu1 %786 }
 0x105   :  { %2015 = vmatprep.mubr.msk.bf16.mxu0 %vm91_vm0, %v2595_v30  ;;  %2040 = vmatpush3.xpose.msk.msra.mxu1 %vm844_vm1, %v2699_v42  ;;  %v1462_v30 = vld [vmem:[#allocation2 + $0x110] sm:$0xff]  ;;  %v1416_v42 = vmax.f32 %v2666_v41, 1e-24  ;;  %v2206_v6 = vpop.eup %2205  ;;  %v1441_v12 = vmul.f32 %v2204_v49, %v2509_v56 }
 0x106   :  { %2084 = vmatpush3.bf16.msra.mxu0 %v1480_v27  ;;  %2041 = vmatprep.subr.msk.mxu1 %vm844_vm1, %v2715_v51  ;;  %v1477_v40 = vpack.c.bf16 %v1462_v30, %v1461_v9  ;;  %v2208_v41 = vpop.eup %2207  ;;  %v2837_v9 = vld [vmem:[#allocation2 + $0x80] ss:$0 sm:$0xff] }
 0x107   :  { %2085 = vmatprep.subr.bf16.mxu0 %v1479_v44  ;;  %2225 = vrsqrt.f32 %v1416_v42  ;;  %v2210_v54 = vpop.eup %2209  ;;  %3970 = vst [vmem:[#allocation9_spill] sm:$0xff] %v2837_v9 }
 0x108   :  { %v2212_v0 = vpop.eup %2211  ;;  %v1451_v56 = vmul.f32 %v2210_v54, %v2549_v20 }
 0x109   :  { %2042 = vmatpush3.xpose.msk.msra.mxu1 %vm844_vm1, %v2715_v51  ;;  %v1440_v51 = vmul.f32 %v2202_v46, %v2503_v53 }
 0x10a   :  { %2086 = vmatpush3.bf16.msra.mxu0 %v1479_v44  ;;  %2043 = vmatprep.subr.msk.mxu1 %vm844_vm1, %v2703_v23 }
 0x10b   :  { %2087 = vmatprep.subr.bf16.mxu0 %v1478_v47  ;;  %v2214_v7 = vpop.eup %2213  ;;  %v2780_v52 = vpack.c.bf16 %v1440_v51, %v1439_v5 }
 0x10c   :  { %2016 = vmatmul.mubr.msk.bf16.gmra.mxu0 %vm91_vm0, %v2593_v24  ;;  %v1442_v24 = vmul.f32 %v2206_v6, %v2511_v57  ;;  %v2216_v1 = vpop.eup %2215  ;;  %v1452_v57 = vmul.f32 %v2212_v0, %v2551_v21  ;;  %v1444_v19 = vmul.f32 %v2214_v7, %v2519_v61 }
 0x10d   :  { %2044 = vmatpush3.xpose.msk.msra.mxu1 %vm844_vm1, %v2703_v23  ;;  %2091 = vmatprep.mubr.bf16.mxu0 %v2761_v48  ;;  %v791_v23 = vpop.permute.xlu1 %790  ;;  %v2218_v53 = vpop.eup %2217  ;;  %v1445_v21 = vmul.f32 %v2216_v1, %v2525_v3 }
 0x10e   :  { %2088 = vmatpush3.bf16.msra.mxu0 %v1478_v47  ;;  %2045 = vmatprep.subr.msk.mxu1 %vm844_vm1, %v2724_v35  ;;  %v2784_v50 = vpack.c.bf16 %v1442_v24, %v1441_v12  ;;  %v2220_v34 = vpop.eup %2219  ;;  %v1460_v20 = vpack.c.bf16 %v1452_v57, %v1451_v56  ;;  %v1446_v25 = vmul.f32 %v2218_v53, %v2527_v4 }
 0x10f   :  { %2089 = vmatprep.subr.bf16.mxu0 %v1477_v40  ;;  %v2222_v62 = vpop.eup %2221  ;;  %v1449_v31 = vmul.f32 %v2220_v34, %v2541_v14 }
 0x110   :  { %v1450_v43 = vmul.f32 %v2222_v62, %v2543_v15  ;;  %v1457_v27 = vpack.c.bf16 %v1446_v25, %v1445_v21  ;;  %v797_v15 = vpop.permute.xlu0 %796  ;;  %v3993_v21 = vmov 0 }
 0x111   :  { %2046 = vmatpush3.xpose.msk.msra.mxu1 %vm844_vm1, %v2724_v35  ;;  %v1443_v35 = vmul.f32 %v2208_v41, %v2517_v60  ;;  %v795_v26 = vpop.permute.xlu1 %794 }
 0x112   :  { %2090 = vmatpush3.bf16.msra.mxu0 %v1477_v40  ;;  %2047 = vmatprep.subr.msk.mxu1 %vm844_vm1, %v2709_v2  ;;  %v1459_v37 = vpack.c.bf16 %v1450_v43, %v1449_v31 }
 0x113   :  { %v1456_v60 = vpack.c.bf16 %v1444_v19, %v1443_v35  ;;  %v3989_v35 = vmov 0 }
 0x115   :  { %2092 = vmatmul.mubr.bf16.vlgmr.msra.gmra.mxu0 %v2780_v52  ;;  %2048 = vmatpush3.xpose.msk.msra.mxu1 %vm844_vm1, %v2709_v2  ;;  %v2224_v2 = vpop.eup %2223  ;;  %v799_v3 = vpop.permute.xlu1 %798 }
 0x116   :  { %2049 = vmatprep.subr.msk.mxu1 %vm844_vm1, %v2735_v33  ;;  %2095 = vmatprep.mubr.bf16.mxu0 %v2784_v50  ;;  %v2226_v61 = vpop.eup %2225  ;;  %v1447_v4 = vmul.f32 %v2224_v2, %v2533_v10  ;;  %v801_v10 = vpop.permute.xlu0 %800 }
 0x117   :  { %v1448_v14 = vmul.f32 %v2226_v61, %v2535_v11 }
 0x119   :  { %2050 = vmatpush3.xpose.msk.msra.mxu1 %vm844_vm1, %v2735_v33  ;;  %v1458_v33 = vpack.c.bf16 %v1448_v14, %v1447_v4  ;;  %v803_v38 = vpop.permute.xlu1 %802 }
 0x11a   :  { %2107 = vmatprep.subr.bf16.mxu1 %v1460_v20  ;;  %v805_v18 = vpop.permute.xlu0 %804 }
 0x11c   :  { %2052 = vmatmul.mubr.msk.f32.vlgmr.msra.gmra.mxu1 %vm844_vm1, %v2747_v16  ;;  %v24_v16 = vlaneseq }
 0x11d   :  { %2096 = vmatmul.mubr.bf16.gmra.mxu0 %v1456_v60  ;;  %2108 = vmatpush3.bf16.xpose.msra.mxu1 %v1460_v20  ;;  %v807_v11 = vpop.permute.xlu1 %806 }
 0x11e   :  { %2054 = vmatprep.mubr.msk.f32.mxu1 %vm844_vm1, %v785_v13  ;;  %2099 = vmatprep.mubr.bf16.mxu0 %v1457_v27  ;;  %v809_v29 = vpop.permute.xlu0 %808  ;;  %v2830_v47 = vshrl.u32 %v24_v16, 7  ;;  %v2832_v17 = vand.u32 127, %v24_v16 }
 0x11f   :  { %2109 = vmatprep.subr.bf16.mxu1 %v1459_v37 }
 0x120   :  { %2055 = vmatmul.mubr.msk.f32.gmra.mxu1 %vm844_vm1, %v2765_v55  ;;  %v2835_v8 = vadd.s32 56, %v2830_v47  ;;  %v2850_v42 = vadd.s32 80, %v2830_v47  ;;  %v2853_v49 = vadd.s32 64, %v2830_v47  ;;  %v2866_v40 = vadd.s32 88, %v2830_v47 }
 0x121   :  { %2057 = vmatprep.mubr.msk.f32.mxu1 %vm844_vm1, %v789_v63  ;;  %v811_v32 = vpop.permute.xlu1 %810  ;;  %v2871_v5 = vadd.s32 72, %v2830_v47  ;;  %v2886_v54 = vadd.s32 112, %v2830_v47  ;;  %v2889_v12 = vadd.s32 96, %v2830_v47  ;;  %v2898_v24 = vadd.s32 8, %v2830_v47 }
 0x122   :  { %v2820_v44 = vpop.permute.xlu0 %320  ;;  %3969 = vst [vmem:[#allocation8_spill] sm:$0xff] %v2835_v8  ;;  %vm3874_vm2 = vcmp.ne.s32.totalorder %v2835_v8, %v2832_v17  ;;  %3971 = vst [vmem:[#allocation10_spill] sm:$0xff] %v2850_v42  ;;  %vm3875_vm4 = vcmp.ne.s32.totalorder %v2850_v42, %v2832_v17  ;;  %vm3876_vm6 = vcmp.ne.s32.totalorder %v2853_v49, %v2832_v17  ;;  %v2901_v13 = vadd.s32 120, %v2830_v47 }
 0x123   :  { %3972 = vst [vmem:[#allocation11_spill] sm:$0xff] %v2853_v49  ;;  %3973 = vst [vmem:[#allocation12_spill] sm:$0xff] %v2866_v40  ;;  %v2904_v0 = vadd.s32 104, %v2830_v47  ;;  %v2935_v53 = vadd.s32 24, %v2830_v47  ;;  %v2951_v57 = vadd.s32 32, %v2830_v47  ;;  %v2968_v63 = vadd.s32 40, %v2830_v47 }
 0x124   :  { %2058 = vmatmul.mubr.msk.f32.gmra.mxu1 %vm844_vm1, %v791_v23  ;;  %3974 = vst [vmem:[#allocation13_spill] sm:$0xff] %v2871_v5  ;;  %3976 = vst [vmem:[#allocation15_spill] sm:$0xff] %v2886_v54  ;;  %v2917_v23 = vadd.s32 16, %v2830_v47 }
 0x125   :  { %2100 = vmatmul.mubr.bf16.gmra.mxu0 %v1458_v33  ;;  %2110 = vmatpush3.bf16.xpose.msra.mxu1 %v1459_v37  ;;  %v326_v39 = vpop.permute.xlu1 %325  ;;  %3977 = vst [vmem:[#allocation16_spill] sm:$0xff] %v2889_v12  ;;  %3978 = vst [vmem:[#allocation17_spill] sm:$0xff] %v2901_v13  ;;  %vm3871_vm13 = vcmp.ne.s32.totalorder %v2935_v53, %v2832_v17  ;;  %vm3873_vm9 = vcmp.ne.s32.totalorder %v2968_v63, %v2832_v17 }
 0x126   :  { %2111 = vmatprep.subr.bf16.mxu1 %v1458_v33  ;;  %2060 = vmatprep.mubr.msk.f32.mxu1 %vm844_vm1, %v793_v28  ;;  %v336_v22 = vpop.permute.xlu0 %335  ;;  %3979 = vst [vmem:[#allocation18_spill] sm:$0xff] %v2904_v0  ;;  %vm403_vm15 = vcmp.eq.f32.partialorder %v326_v39, %v2837_v9  ;;  %vm3869_vm0 = vcmp.ne.s32.totalorder %v2917_v23, %v2832_v17  ;;  %3985 = vst [vmem:[#allocation20_spill] sm:$0xff] %v2951_v57  ;;  %v4009_v39 = vmov 0 }
 0x127   :  { %2103 = vmatprep.mubr.bf16.mxu0 %v1459_v37  ;;  %vm405_vm12 = vcmp.eq.f32.partialorder %v336_v22, %v2837_v9  ;;  %3988 = vst [vmem:[#allocation21_spill] sm:$0xff] %v2968_v63 }
 0x128   :  { %2061 = vmatmul.mubr.msk.f32.gmra.mxu1 %vm844_vm1, %v795_v26  ;;  %v3996_v26 = vmov 0 }
 0x129   :  { %2063 = vmatprep.mubr.msk.f32.mxu1 %vm844_vm1, %v797_v15  ;;  %v331_v36 = vpop.permute.xlu1 %330 }
 0x12a   :  { %v2828_v59 = vpop.permute.xlu0 %345  ;;  %vm404_vm11 = vcmp.eq.f32.partialorder %v331_v36, %v2837_v9 }
 0x12c   :  { %2064 = vmatmul.mubr.msk.f32.gmra.mxu1 %vm844_vm1, %v799_v3 }
 0x12d   :  { %2104 = vmatmul.mubr.bf16.gmra.mxu0 %v1460_v20  ;;  %2112 = vmatpush3.bf16.xpose.msra.mxu1 %v1458_v33  ;;  %v2823_v45 = vpop.permute.xlu1 %340  ;;  %v2985_v20 = vadd.s32 48, %v2830_v47 }
 0x12e   :  { %2113 = vmatprep.subr.bf16.mxu1 %v1457_v27  ;;  %2066 = vmatprep.mubr.msk.f32.mxu1 %vm844_vm1, %v801_v10  ;;  %v2841_v46 = vpop.permute.xlu0 %355 }
 0x12f   :  { %vm409_vm3 = vcmp.eq.f32.partialorder %v2841_v46, %v2837_v9  ;;  %3992 = vst [vmem:[#allocation23_spill] sm:$0xff] %v2985_v20  ;;  %vm3877_vm10 = vcmp.ne.s32.totalorder %v2985_v20, %v2832_v17 }
 0x130   :  { %2067 = vmatmul.mubr.msk.f32.gmra.mxu1 %vm844_vm1, %v803_v38 }
 0x131   :  { %2069 = vmatprep.mubr.msk.f32.mxu1 %vm844_vm1, %v805_v18  ;;  %v2826_v58 = vpop.permute.xlu1 %350 }
 0x132   :  { %v2857_v6 = vpop.permute.xlu0 %365 }
 0x134   :  { %2070 = vmatmul.mubr.msk.f32.gmra.mxu1 %vm844_vm1, %v807_v11 }
 0x135   :  { %2114 = vmatpush3.bf16.xpose.msra.mxu1 %v1457_v27  ;;  %2072 = vmatprep.mubr.msk.f32.mxu1 %vm844_vm1, %v809_v29  ;;  %v2839_v30 = vpop.permute.xlu1 %360 }
 0x136   :  { %2115 = vmatprep.subr.bf16.mxu1 %v1456_v60  ;;  %v2868_v41 = vpop.permute.xlu0 %375 }
 0x138   :  { %2073 = vmatmul.mubr.msk.f32.gmra.mxu1 %vm844_vm1, %v811_v32  ;;  %vm3870_vm1 = vcmp.ne.s32.totalorder %v2898_v24, %v2832_v17 }
 0x139   :  { %v2855_v55 = vpop.permute.xlu1 %370  ;;  %vm2924_vm14 = vmand %vm403_vm15, %vm3870_vm1  ;;  %vm3872_vm1 = vcmp.ne.s32.totalorder %v2951_v57, %v2832_v17 }
 0x13a   :  { %vm412_vm5 = vcmp.eq.f32.partialorder %v2855_v55, %v2837_v9  ;;  %v2906_v7 = vpop.permute.xlu0 %385  ;;  %vm2940_vm15 = vmand %vm404_vm11, %vm3869_vm0  ;;  %vm406_vm0 = vcmp.eq.f32.partialorder %v2823_v45, %v2837_v9  ;;  %v4019_v55 = vmov 0 }
 0x13b   :  { %3980 = vst [vmem:[#allocation19_spill] sm:$0xff] %v2906_v7  ;;  %vm2956_vm11 = vmand %vm405_vm12, %vm3871_vm13  ;;  %vm407_vm13 = vcmp.eq.f32.partialorder %v2828_v59, %v2837_v9 }
 0x13c   :  { %vm2973_vm12 = vmand %vm406_vm0, %vm3872_vm1  ;;  %vm408_vm1 = vcmp.eq.f32.partialorder %v2826_v58, %v2837_v9 }
 0x13d   :  { %2116 = vmatpush3.bf16.xpose.msra.mxu1 %v1456_v60  ;;  %v2883_v51 = vpop.permute.xlu1 %380  ;;  %v3990_v35 = vsel %vm2973_vm12, 4294967295, %v3989_v35  ;;  %vm2990_vm0 = vmand %vm407_vm13, %vm3873_vm9  ;;  %vm402_vm13 = vcmp.eq.f32.partialorder %v2820_v44, %v2837_v9  ;;  %vm3878_vm9 = vcmp.ne.s32.totalorder %v2830_v47, %v2832_v17 }
 0x13e   :  { %2117 = vmatprep.subr.bf16.mxu1 %v2784_v50  ;;  %3975 = vst [vmem:[#allocation14_spill] sm:$0xff] %v2883_v51  ;;  %3991 = vst [vmem:[#allocation22_spill] sm:$0xff] %v3990_v35  ;;  %v3994_v21 = vsel %vm2990_vm0, 4294967295, %v3993_v21 }
 0x13f   :  { %3995 = vst [vmem:[#allocation24_spill] sm:$0xff] %v3994_v21  ;;  %vm3004_vm8 = vmand %vm408_vm1, %vm3877_vm10  ;;  %vm4024_vm10 = vcmp.eq.f32.partialorder %v2857_v6, %v2837_v9 }
 0x140   :  { %v3997_v26 = vsel %vm3004_vm8, 4294967295, %v3996_v26  ;;  %vm3018_vm7 = vmand %vm402_vm13, %vm3878_vm9  ;;  %vm410_vm13 = vcmp.eq.f32.partialorder %v2839_v30, %v2837_v9 }
 0x141   :  { %3998 = vst [vmem:[#allocation25_spill] sm:$0xff] %v3997_v26  ;;  %vm3050_vm1 = vmand %vm409_vm3, %vm3874_vm2 }
 0x142   :  { %vm3072_vm3 = vmand %vm412_vm5, %vm3875_vm4  ;;  %vm4017_vm5 = vcmp.ne.s32.totalorder %v2866_v40, %v2832_v17 }
 0x143   :  { %v4010_v39 = vsel %vm3072_vm3, 4294967295, %v4009_v39  ;;  %vm3082_vm2 = vmand %vm410_vm13, %vm3876_vm6  ;;  %vm4018_vm13 = vcmp.eq.f32.partialorder %v2868_v41, %v2837_v9  ;;  %vm4023_vm6 = vcmp.ne.s32.totalorder %v2871_v5, %v2832_v17 }
 0x144   :  { %4011 = vst [vmem:[#allocation32_spill] sm:$0xff] %v4010_v39  ;;  %vm3103_vm4 = vmand %vm4018_vm13, %vm4017_vm5 }
 0x145   :  { %2118 = vmatpush3.bf16.xpose.msra.mxu1 %v2784_v50  ;;  %v4020_v55 = vsel %vm3103_vm4, 4294967295, %v4019_v55  ;;  %vm3118_vm9 = vmand %vm4024_vm10, %vm4023_vm6 }
 0x146   :  { %2119 = vmatprep.subr.bf16.mxu1 %v2780_v52  ;;  %4021 = vst [vmem:[#allocation36_spill] sm:$0xff] %v4020_v55 }
 0x14d   :  { %2120 = vmatpush3.bf16.xpose.msra.mxu1 %v2780_v52 }
 0x14e   :  { %2121 = vmatprep.subr.bf16.mxu1 %v2761_v48 }
 0x155   :  { %2122 = vmatpush3.bf16.xpose.msra.mxu1 %v2761_v48  ;;  %v3879_v48 = vmov 0.0  }
 0x156   :  { %v611_v52 = vsel %vm2924_vm14, 1.0, %v3879_v48  ;;  %v612_v56 = vsel %vm2940_vm15, 1.0, %v3879_v48  ;;  %v613_v62 = vsel %vm2956_vm11, 1.0, %v3879_v48  ;;  %v614_v19 = vsel %vm2973_vm12, 1.0, %v3879_v48 }
 0x157   :  { %628 = vadd.xlane.f32.xlu0 %v611_v52  ;;  %v615_v25 = vsel %vm2990_vm0, 1.0, %v3879_v48  ;;  %v616_v31 = vsel %vm3004_vm8, 1.0, %v3879_v48  ;;  %v610_v2 = vsel %vm3018_vm7, 1.0, %v3879_v48 }
 0x158   :  { %626 = vadd.xlane.f32.xlu1 %v610_v2 }
 0x15b   :  { %630 = vadd.xlane.f32.xlu0 %v612_v56 }
 0x15f   :  { %632 = vadd.xlane.f32.xlu0 %v613_v62 }
 0x163   :  { %634 = vadd.xlane.f32.xlu0 %v614_v19 }
 0x167   :  { %636 = vadd.xlane.f32.xlu0 %v615_v25 }
 0x16b   :  { %638 = vadd.xlane.f32.xlu0 %v616_v31 }
 0x1b4   :  { %v3025_v60 = vpop.f32.mrf.mxu0 }
 0x1b5   :  { %v1861_v25 = vadd.f32 -1.0, %v3025_v60 }
 0x1b6   :  { %v3027_v61 = vpop.f32.mrf.mxu0 }
 0x1b7   :  { %v1859_v5 = vadd.f32 -1.0, %v3027_v61 }
 0x1b8   :  { %v3029_v27 = vpop.f32.mrf.mxu0 }
 0x1b9   :  { %v3164_v7 = vadd.f32 -1.0, %v3029_v27 }
 0x1ba   :  { %v3031_v28 = vpop.f32.mrf.mxu0 }
 0x1bc   :  { %v3033_v37 = vpop.f32.mrf.mxu0 }
 0x1bd   :  { %4001 = vst [vmem:[#allocation26_spill] sm:$0xff] %v3033_v37 }
 0x1be   :  { %v3035_v3 = vpop.f32.mrf.mxu0 }
 0x1c0   :  { %v3037_v4 = vpop.f32.mrf.mxu0 }
 0x1c1   :  { %4002 = vst [vmem:[#allocation27_spill] sm:$0xff] %v3037_v4  ;;  %v1866_v14 = vadd.f32 -1.0, %v3037_v4 }
 0x1c2   :  { %v3040_v15 = vpop.f32.mrf.mxu0 }
 0x1c3   :  { %4003 = vst [vmem:[#allocation28_spill] sm:$0xff] %v3040_v15  ;;  %v3042_v33 = vmul.f32 10.0, %v1866_v14 }
 0x1c4   :  { %v3054_v10 = vpop.f32.mrf.mxu0 }
 0x1c5   :  { %4004 = vst [vmem:[#allocation29_spill] sm:$0xff] %v3042_v33  ;;  %4007 = vst [vmem:[#allocation30_spill] sm:$0xff] %v3054_v10  ;;  %v1869_v11 = vadd.f32 -1.0, %v3054_v10 }
 0x1c6   :  { %v3059_v18 = vpop.f32.mrf.mxu0 }
 0x1c7   :  { %4008 = vst [vmem:[#allocation31_spill] sm:$0xff] %v3059_v18  ;;  %v3064_v29 = vmul.f32 10.0, %v1869_v11  ;;  %v1867_v36 = vadd.f32 -1.0, %v3059_v18 }
 0x1c8   :  { %v3077_v44 = vpop.f32.mrf.mxu0 }
 0x1c9   :  { %4012 = vst [vmem:[#allocation33_spill] sm:$0xff] %v3077_v44  ;;  %v3086_v22 = vmul.f32 10.0, %v1867_v36  ;;  %v1870_v16 = vadd.f32 -1.0, %v3077_v44 }
 0x1ca   :  { %v3089_v58 = vpop.f32.mrf.mxu0  ;;  %v4079_v50 = vld [vmem:[#allocation28_spill] sm:$0xff] }
 0x1cb   :  { %4015 = vst [vmem:[#allocation34_spill] sm:$0xff] %v3086_v22  ;;  %4016 = vst [vmem:[#allocation35_spill] sm:$0xff] %v3089_v58  ;;  %v3094_v30 = vmul.f32 10.0, %v1870_v16  ;;  %v1868_v46 = vadd.f32 -1.0, %v3089_v58 }
 0x1cc   :  { %v3107_v52 = vpop.f32.mrf.mxu0 }
 0x1cd   :  { %4022 = vst [vmem:[#allocation37_spill] sm:$0xff] %v3107_v52  ;;  %v3122_v41 = vmul.f32 10.0, %v1868_v46  ;;  %v4152_v62 = vsel %vm3103_vm4, %v3094_v30, 0.0 }
 0x1ce   :  { %v3124_v19 = vpop.f32.mrf.mxu0 }
 0x1cf   :  { %4027 = vst [vmem:[#allocation38_spill] sm:$0xff] %v3122_v41  ;;  %4028 = vst [vmem:[#allocation39_spill] sm:$0xff] %v3124_v19 }
 0x1d0   :  { %v3129_v31 = vpop.f32.mrf.mxu0 }
 0x1d1   :  { %4029 = vst [vmem:[#allocation40_spill] sm:$0xff] %v3129_v31 }
 0x1d2   :  { %v3134_v14 = vpop.f32.mrf.mxu0 }
 0x1d3   :  { %4030 = vst [vmem:[#allocation41_spill] sm:$0xff] %v3134_v14 }
 0x1d5   :  { %v2093_v6 = vpop.f32.mrf.mxu0 }
 0x1d7   :  { %v1519_v11 = vpop.f32.mrf.mxu0 }
 0x1d9   :  { %v2094_v36 = vpop.f32.mrf.mxu0 }
 0x1da   :  { %v1583_v56 = vpack.c.bf16 %v2094_v36, %v2093_v6  ;;  %v3145_v6 = vmul.f32 10.0, %v1861_v25 }
 0x1db   :  { %v1522_v16 = vpop.f32.mrf.mxu0 }
 0x1dc   :  { %v1582_v46 = vpack.c.bf16 %v1522_v16, %v1519_v11  ;;  %v2053_v59 = vpop.f32.mrf.mxu1 }
 0x1dd   :  { %v3136_v32 = vmax.f32 %v2053_v59, 0.0  ;;  %v2097_v48 = vpop.f32.mrf.mxu0 }
 0x1de   :  { %2123 = vmatprep.mubr.bf16.mxu1 %v1582_v46  ;;  %v975_v40 = vpop.f32.mrf.mxu1 }
 0x1df   :  { %2227 = vrsqrt.f32 %v3136_v32  ;;  %v3140_v13 = vmax.f32 %v975_v40, 0.0  ;;  %v1535_v2 = vpop.f32.mrf.mxu0  ;;  %2124 = vmatmul.mubr.bf16.vlgmr.msra.gmra.mxu1 %v1583_v56  ;;  %vm4031_vm5 = vcmp.eq.f32.partialorder %v3136_v32, inf  ;;  %vm4032_vm6 = vcmp.eq.f32.partialorder %v3136_v32, 0.0 }
 0x1e0   :  { %v2056_v42 = vpop.f32.mrf.mxu1 }
 0x1e1   :  { %2229 = vrsqrt.f32 %v3140_v13  ;;  %v3143_v44 = vmax.f32 %v2056_v42, 0.0  ;;  %v2098_v11 = vpop.f32.mrf.mxu0  ;;  %v470_v42 = vmul.f32 1.442695, %v3145_v6 }
 0x1e2   :  { %v985_v59 = vpop.f32.mrf.mxu1  ;;  %v1585_v40 = vpack.c.bf16 %v2098_v11, %v2097_v48  ;;  %v3161_v11 = vmul.f32 10.0, %v1859_v5 }
 0x1e3   :  { %2231 = vrsqrt.f32 %v3143_v44  ;;  %v3148_v36 = vmax.f32 %v985_v59, 0.0  ;;  %v1538_v16 = vpop.f32.mrf.mxu0  ;;  %v1096_v8 = vand.u32 2147483648, %v3143_v44 }
 0x1e4   :  { %v1584_v46 = vpack.c.bf16 %v1538_v16, %v1535_v2  ;;  %v2059_v26 = vpop.f32.mrf.mxu1 }
 0x1e5   :  { %2233 = vrsqrt.f32 %v3148_v36  ;;  %v3151_v56 = vmax.f32 %v2059_v26, 0.0  ;;  %v2101_v54 = vpop.f32.mrf.mxu0  ;;  %v1089_v18 = vand.u32 2147483648, %v3148_v36 }
 0x1e6   :  { %2127 = vmatprep.mubr.bf16.mxu1 %v1584_v46  ;;  %v995_v25 = vpop.f32.mrf.mxu1 }
 0x1e7   :  { %2235 = vrsqrt.f32 %v3151_v56  ;;  %v3156_v10 = vmax.f32 %v995_v25, 0.0  ;;  %v1551_v59 = vpop.f32.mrf.mxu0  ;;  %2128 = vmatmul.mubr.bf16.gmra.mxu1 %v1585_v40  ;;  %vm4042_vm13 = vcmp.eq.f32.partialorder %v3151_v56, 0.0 }
 0x1e8   :  { %v2062_v2 = vpop.f32.mrf.mxu1 }
 0x1e9   :  { %2237 = vrsqrt.f32 %v3156_v10  ;;  %v3159_v48 = vmax.f32 %v2062_v2, 0.0  ;;  %v2102_v26 = vpop.f32.mrf.mxu0  ;;  %vm4040_vm8 = vcmp.eq.f32.partialorder %v3156_v10, inf }
 0x1ea   :  { %2239 = vpow2.f32 %v470_v42  ;;  %v1005_v16 = vpop.f32.mrf.mxu1  ;;  %v1082_v42 = vand.u32 2147483648, %v3136_v32  ;;  %v1587_v5 = vpack.c.bf16 %v2102_v26, %v2101_v54 }
 0x1eb   :  { %2241 = vrsqrt.f32 %v3159_v48  ;;  %v3167_v46 = vmax.f32 %v1005_v16, 0.0  ;;  %v1554_v25 = vpop.f32.mrf.mxu0  ;;  %vm1121_vm10 = vcmp.eq.f32.partialorder %v3159_v48, inf }
 0x1ec   :  { %v2228_v40 = vpop.eup %2227  ;;  %v1586_v0 = vpack.c.bf16 %v1554_v25, %v1551_v59  ;;  %v2065_v49 = vpop.f32.mrf.mxu1  ;;  %v1075_v59 = vand.u32 2147483648, %v3140_v13 }
 0x1ed   :  { %2243 = vrsqrt.f32 %v3167_v46  ;;  %v3174_v2 = vmax.f32 %v2065_v49, 0.0  ;;  %v2105_v58 = vpop.f32.mrf.mxu0  ;;  %v1078_v16 = vmul.f32 %v2228_v40, %v3136_v32 }
 0x1ee   :  { %v2230_v9 = vpop.eup %2229  ;;  %2131 = vmatprep.mubr.bf16.mxu1 %v1586_v0  ;;  %v1015_v51 = vpop.f32.mrf.mxu1 }
 0x1ef   :  { %2245 = vrsqrt.f32 %v3174_v2  ;;  %v3182_v54 = vmax.f32 %v1015_v51, 0.0  ;;  %v1567_v49 = vpop.f32.mrf.mxu0  ;;  %2132 = vmatmul.mubr.bf16.gmra.mxu1 %v1587_v5  ;;  %v1080_v26 = vsel %vm4031_vm5, %v3136_v32, %v1078_v16  ;;  %v1071_v0 = vmul.f32 %v2230_v9, %v3140_v13 }
 0x1f0   :  { %v2232_v25 = vpop.eup %2231  ;;  %v2068_v40 = vpop.f32.mrf.mxu1  ;;  %v3190_v12 = vsel %vm4032_vm6, %v1082_v42, %v1080_v26  ;;  %vm4033_vm5 = vcmp.eq.f32.partialorder %v3140_v13, inf  ;;  %vm4034_vm6 = vcmp.eq.f32.partialorder %v3140_v13, 0.0  ;;  %vm1137_vm0 = vcmp.eq.f32.partialorder %v3174_v2, 0.0 }
 0x1f1   :  { %2247 = vrsqrt.f32 %v3182_v54  ;;  %v3196_v51 = vmax.f32 %v2068_v40, 0.0  ;;  %v2106_v5 = vpop.f32.mrf.mxu0  ;;  %1184 = vmax.xlane.f32.xlu0 %v3190_v12  ;;  %v1092_v9 = vmul.f32 %v2232_v25, %v3143_v44  ;;  %v1073_v32 = vsel %vm4033_vm5, %v3140_v13, %v1071_v0 }
 0x1f2   :  { %v2234_v42 = vpop.eup %2233  ;;  %v1025_v16 = vpop.f32.mrf.mxu1  ;;  %v3205_v26 = vsel %vm4034_vm6, %v1075_v59, %v1073_v32  ;;  %vm4035_vm5 = vcmp.eq.f32.partialorder %v3143_v44, inf  ;;  %v1589_v32 = vpack.c.bf16 %v2106_v5, %v2105_v58  ;;  %vm4036_vm6 = vcmp.eq.f32.partialorder %v3143_v44, 0.0 }
 0x1f3   :  { %2249 = vrsqrt.f32 %v3196_v51  ;;  %v3211_v40 = vmax.f32 %v1025_v16, 0.0  ;;  %v1570_v25 = vpop.f32.mrf.mxu0  ;;  %v1094_v0 = vsel %vm4035_vm5, %v3143_v44, %v1092_v9  ;;  %1182 = vmax.xlane.f32.xlu1 %v3205_v26  ;;  %v1085_v13 = vmul.f32 %v2234_v42, %v3148_v36 }
 0x1f4   :  { %v2236_v59 = vpop.eup %2235  ;;  %v1588_v21 = vpack.c.bf16 %v1570_v25, %v1567_v49  ;;  %v2071_v35 = vpop.f32.mrf.mxu1  ;;  %v3220_v20 = vsel %vm4036_vm6, %v1096_v8, %v1094_v0  ;;  %v1110_v16 = vand.u32 2147483648, %v3151_v56  ;;  %vm4037_vm5 = vcmp.eq.f32.partialorder %v3148_v36, inf }
 0x1f5   :  { %2251 = vrsqrt.f32 %v3211_v40  ;;  %v3224_v4 = vmax.f32 %v2071_v35, 0.0  ;;  %1188 = vmax.xlane.f32.xlu0 %v3220_v20  ;;  %v1087_v9 = vsel %vm4037_vm5, %v3148_v36, %v1085_v13  ;;  %v1106_v58 = vmul.f32 %v2236_v59, %v3151_v56 }
 0x1f6   :  { %v2238_v49 = vpop.eup %2237  ;;  %2135 = vmatprep.mubr.bf16.mxu1 %v1588_v21  ;;  %v1035_v5 = vpop.f32.mrf.mxu1  ;;  %vm4038_vm6 = vcmp.eq.f32.partialorder %v3148_v36, 0.0  ;;  %v1103_v35 = vand.u32 2147483648, %v3156_v10  ;;  %vm4039_vm5 = vcmp.eq.f32.partialorder %v3151_v56, inf  ;;  %v1124_v0 = vand.u32 2147483648, %v3159_v48 }
 0x1f7   :  { %v3233_v8 = vsel %vm4038_vm6, %v1089_v18, %v1087_v9  ;;  %v3238_v44 = vpop.eup %2239  ;;  %2253 = vrsqrt.f32 %v3224_v4  ;;  %v3241_v42 = vmax.f32 %v1035_v5, 0.0  ;;  %2136 = vmatmul.mubr.bf16.gmra.mxu1 %v1589_v32  ;;  %v1099_v21 = vmul.f32 %v2238_v49, %v3156_v10 }
 0x1f8   :  { %v1108_v18 = vsel %vm4039_vm5, %v3151_v56, %v1106_v58  ;;  %v2242_v36 = vpop.eup %2241  ;;  %v2074_v25 = vpop.f32.mrf.mxu1  ;;  %vm4041_vm5 = vcmp.eq.f32.partialorder %v3156_v10, 0.0  ;;  %vm1116_vm6 = vcmp.eq.f32.partialorder %v3167_v46, 0.0  ;;  %v466_v56 = vmul.f32 1.442695, %v3161_v11 }
 0x1f9   :  { %2255 = vrsqrt.f32 %v3241_v42  ;;  %v3252_v13 = vmax.f32 %v2074_v25, 0.0  ;;  %1186 = vmax.xlane.f32.xlu0 %v3233_v8  ;;  %v1101_v59 = vsel %vm4040_vm8, %v3156_v10, %v1099_v21  ;;  %v1120_v32 = vmul.f32 %v2242_v36, %v3159_v48 }
 0x1fa   :  { %v2244_v9 = vpop.eup %2243  ;;  %v1045_v58 = vpop.f32.mrf.mxu1  ;;  %v3261_v49 = vsel %vm4041_vm5, %v1103_v35, %v1101_v59  ;;  %v3265_v5 = vsel %vm4042_vm13, %v1110_v16, %v1108_v18  ;;  %v1117_v25 = vand.u32 2147483648, %v3167_v46  ;;  %v3279_v16 = vmul.f32 10.0, %v3164_v7 }
 0x1fb   :  { %2257 = vrsqrt.f32 %v3252_v13  ;;  %v3270_v55 = vmax.f32 %v1045_v58, 0.0  ;;  %1190 = vmax.xlane.f32.xlu1 %v3261_v49  ;;  %v1113_v21 = vmul.f32 %v2244_v9, %v3167_v46  ;;  %v1122_v10 = vsel %vm1121_vm10, %v3159_v48, %v1120_v32 }
 0x1fc   :  { %v2246_v35 = vpop.eup %2245  ;;  %v1860_v18 = vadd.f32 -1.0, %v3031_v28  ;;  %vm1135_vm8 = vcmp.eq.f32.partialorder %v3174_v2, inf  ;;  %vm4043_vm13 = vcmp.eq.f32.partialorder %v3167_v46, inf  ;;  %v1138_v32 = vand.u32 2147483648, %v3174_v2 }
 0x1fd   :  { %2259 = vrsqrt.f32 %v3270_v55  ;;  %1192 = vmax.xlane.f32.xlu0 %v3265_v5  ;;  %v1115_v36 = vsel %vm4043_vm13, %v3167_v46, %v1113_v21  ;;  %v1134_v59 = vmul.f32 %v2246_v35, %v3174_v2  ;;  %vm4044_vm10 = vcmp.eq.f32.partialorder %v3159_v48, 0.0 }
 0x1fe   :  { %v2248_v9 = vpop.eup %2247  ;;  %v3292_v7 = vsel %vm1116_vm6, %v1117_v25, %v1115_v36  ;;  %v3296_v58 = vsel %vm4044_vm10, %v1124_v0, %v1122_v10  ;;  %vm1128_vm5 = vcmp.eq.f32.partialorder %v3182_v54, inf  ;;  %v1131_v39 = vand.u32 2147483648, %v3182_v54 }
 0x1ff   :  { %4045 = vst [vmem:[#allocation42_spill] sm:$0xff] %v3296_v58  ;;  %1194 = vmax.xlane.f32.xlu1 %v3292_v7  ;;  %v1127_v21 = vmul.f32 %v2248_v9, %v3182_v54  ;;  %vm1130_vm13 = vcmp.eq.f32.partialorder %v3182_v54, 0.0  ;;  %v1136_v35 = vsel %vm1135_vm8, %v3174_v2, %v1134_v59  ;;  %v472_v25 = vmul.f32 1.442695, %v3279_v16 }
 0x200   :  { %v2250_v46 = vpop.eup %2249  ;;  %v3306_v48 = vmul.f32 10.0, %v1860_v18  ;;  %v1865_v0 = vadd.f32 -1.0, %v3033_v37  ;;  %vm1149_vm6 = vcmp.eq.f32.partialorder %v3196_v51, inf  ;;  %2261 = vpow2.f32 %v466_v56 }
 0x201   :  { %1196 = vmax.xlane.f32.xlu0 %v3296_v58  ;;  %v1129_v10 = vsel %vm1128_vm5, %v3182_v54, %v1127_v21  ;;  %vm1142_vm10 = vcmp.eq.f32.partialorder %v3211_v40, inf  ;;  %v1148_v36 = vmul.f32 %v2250_v46, %v3196_v51  ;;  %v3316_v9 = vsel %vm1137_vm0, %v1138_v32, %v1136_v35 }
 0x202   :  { %v2252_v59 = vpop.eup %2251  ;;  %v3314_v2 = vsel %vm1130_vm13, %v1131_v39, %v1129_v10  ;;  %4047 = vst [vmem:[#allocation44_spill] sm:$0xff] %v3316_v9  ;;  %v1145_v18 = vand.u32 2147483648, %v3211_v40  ;;  %v1152_v63 = vand.u32 2147483648, %v3196_v51  ;;  %vm1144_vm8 = vcmp.eq.f32.partialorder %v3211_v40, 0.0 }
 0x203   :  { %4046 = vst [vmem:[#allocation43_spill] sm:$0xff] %v3314_v2  ;;  %1198 = vmax.xlane.f32.xlu1 %v3314_v2  ;;  %v1141_v56 = vmul.f32 %v2252_v59, %v3211_v40  ;;  %v1150_v54 = vsel %vm1149_vm6, %v3196_v51, %v1148_v36  ;;  %vm1151_vm5 = vcmp.eq.f32.partialorder %v3196_v51, 0.0  ;;  %2263 = vpow2.f32 %v472_v25 }
 0x204   :  { %v2254_v21 = vpop.eup %2253  ;;  %v468_v39 = vmul.f32 1.442695, %v3306_v48  ;;  %v3326_v32 = vmul.f32 10.0, %v1865_v0  ;;  %vm1163_vm0 = vcmp.eq.f32.partialorder %v3224_v4, inf  ;;  %v1863_v35 = vadd.f32 -1.0, %v3035_v3 }
 0x205   :  { %1200 = vmax.xlane.f32.xlu0 %v3316_v9  ;;  %v1143_v46 = vsel %vm1142_vm10, %v3211_v40, %v1141_v56  ;;  %vm1156_vm13 = vcmp.eq.f32.partialorder %v3241_v42, inf  ;;  %v1162_v51 = vmul.f32 %v2254_v21, %v3224_v4  ;;  %v3338_v36 = vsel %vm1151_vm5, %v1152_v63, %v1150_v54 }
 0x206   :  { %4048 = vst [vmem:[#allocation45_spill] sm:$0xff] %v3326_v32  ;;  %v2256_v10 = vpop.eup %2255  ;;  %v3336_v25 = vsel %vm1144_vm8, %v1145_v18, %v1143_v46  ;;  %4050 = vst [vmem:[#allocation47_spill] sm:$0xff] %v3338_v36  ;;  %v1159_v0 = vand.u32 2147483648, %v3241_v42  ;;  %v1166_v59 = vand.u32 2147483648, %v3224_v4  ;;  %vm1158_vm6 = vcmp.eq.f32.partialorder %v3241_v42, 0.0 }
 0x207   :  { %4049 = vst [vmem:[#allocation46_spill] sm:$0xff] %v3336_v25  ;;  %1202 = vmax.xlane.f32.xlu1 %v3336_v25  ;;  %v1155_v9 = vmul.f32 %v2256_v10, %v3241_v42  ;;  %v1164_v40 = vsel %vm1163_vm0, %v3224_v4, %v1162_v51  ;;  %vm1165_vm10 = vcmp.eq.f32.partialorder %v3224_v4, 0.0  ;;  %2265 = vpow2.f32 %v468_v39 }
 0x208   :  { %v2258_v56 = vpop.eup %2257  ;;  %v478_v18 = vmul.f32 1.442695, %v3326_v32  ;;  %vm1177_vm8 = vcmp.eq.f32.partialorder %v3252_v13, inf  ;;  %v3349_v63 = vmul.f32 10.0, %v1863_v35  ;;  %vm1170_vm5 = vcmp.eq.f32.partialorder %v3270_v55, inf }
 0x209   :  { %1204 = vmax.xlane.f32.xlu0 %v3338_v36  ;;  %v1157_v54 = vsel %vm1156_vm13, %v3241_v42, %v1155_v9  ;;  %v1176_v21 = vmul.f32 %v2258_v56, %v3252_v13  ;;  %v3359_v39 = vsel %vm1165_vm10, %v1166_v59, %v1164_v40  ;;  %v1173_v51 = vand.u32 2147483648, %v3270_v55 }
 0x20a   :  { %4051 = vst [vmem:[#allocation48_spill] sm:$0xff] %v3349_v63  ;;  %v2260_v46 = vpop.eup %2259  ;;  %v3357_v4 = vsel %vm1158_vm6, %v1159_v0, %v1157_v54  ;;  %4053 = vst [vmem:[#allocation50_spill] sm:$0xff] %v3359_v39  ;;  %v1180_v35 = vand.u32 2147483648, %v3252_v13  ;;  %vm1172_vm0 = vcmp.eq.f32.partialorder %v3270_v55, 0.0  ;;  %vm1179_vm13 = vcmp.eq.f32.partialorder %v3252_v13, 0.0 }
 0x20b   :  { %4052 = vst [vmem:[#allocation49_spill] sm:$0xff] %v3357_v4  ;;  %1206 = vmax.xlane.f32.xlu1 %v3357_v4  ;;  %v1169_v10 = vmul.f32 %v2260_v46, %v3270_v55  ;;  %v1178_v42 = vsel %vm1177_vm8, %v3252_v13, %v1176_v21  ;;  %2267 = vpow2.f32 %v478_v18  ;;  %v474_v9 = vmul.f32 1.442695, %v3349_v63 }
 0x20c   :  { %v1864_v0 = vadd.f32 -1.0, %v3040_v15  ;;  %v3376_v54 = vsel %vm1179_vm13, %v1180_v35, %v1178_v42  ;;  %v480_v13 = vmul.f32 1.442695, %v3042_v33  ;;  %vm4075_vm6 = vcmp.ne.s32.totalorder %v2898_v24, %v2832_v17 }
 0x20d   :  { %1208 = vmax.xlane.f32.xlu0 %v3359_v39  ;;  %v1171_v59 = vsel %vm1170_vm5, %v3270_v55, %v1169_v10  ;;  %v2262_v40 = vpop.eup %2261  ;;  %4055 = vst [vmem:[#allocation52_spill] sm:$0xff] %v3376_v54  ;;  %2269 = vpow2.f32 %v474_v9  ;;  %v484_v10 = vmul.f32 1.442695, %v3122_v41  ;;  %vm4077_vm10 = vcmp.ne.s32.totalorder %v2935_v53, %v2832_v17 }
 0x20e   :  { %v3374_v56 = vsel %vm1172_vm0, %v1173_v51, %v1171_v59  ;;  %v3380_v18 = vmul.f32 10.0, %v1864_v0  ;;  %2271 = vpow2.f32 %v480_v13  ;;  %v482_v51 = vmul.f32 1.442695, %v3086_v22 }
 0x20f   :  { %4054 = vst [vmem:[#allocation51_spill] sm:$0xff] %v3374_v56  ;;  %1210 = vmax.xlane.f32.xlu1 %v3374_v56 }
 0x210   :  { %v2264_v21 = vpop.eup %2263  ;;  %4056 = vst [vmem:[#allocation53_spill] sm:$0xff] %v3380_v18  ;;  %v476_v55 = vmul.f32 1.442695, %v3380_v18 }
 0x211   :  { %1212 = vmax.xlane.f32.xlu0 %v3376_v54 }
 0x212   :  { %2273 = vpow2.f32 %v476_v55 }
 0x213   :  { %502 = vadd.xlane.f32.xlu1 %v3238_v44  ;;  %2275 = vpow2.f32 %v482_v51 }
 0x214   :  { %v2266_v46 = vpop.eup %2265  ;;  %2277 = vpow2.f32 %v484_v10 }
 0x215   :  { %504 = vadd.xlane.f32.xlu0 %v2264_v21 }
 0x217   :  { %498 = vadd.xlane.f32.xlu1 %v2262_v40  ;;  %v3387_v40 = vpop.permute.xlu0 %395 }
 0x218   :  { %v2268_v35 = vpop.eup %2267  ;;  %4057 = vst [vmem:[#allocation54_spill] sm:$0xff] %v3387_v40 }
 0x219   :  { %500 = vadd.xlane.f32.xlu0 %v2266_v46 }
 0x21a   :  { %v2270_v42 = vpop.eup %2269 }
 0x21b   :  { %510 = vadd.xlane.f32.xlu1 %v2268_v35  ;;  %v2272_v9 = vpop.eup %2271  ;;  %v3389_v21 = vpop.xlane.xlu0 %628 }
 0x21c   :  { %4058 = vst [vmem:[#allocation55_spill] sm:$0xff] %v3389_v21  ;;  %v3399_v35 = vpop.permute.xlu1 %390 }
 0x21d   :  { %4063 = vst [vmem:[#allocation60_spill] sm:$0xff] %v3399_v35 }
 0x21f   :  { %506 = vadd.xlane.f32.xlu1 %v2270_v42  ;;  %v2274_v44 = vpop.eup %2273  ;;  %v3391_v13 = vpop.xlane.xlu0 %630 }
 0x220   :  { %v2276_v0 = vpop.eup %2275  ;;  %4059 = vst [vmem:[#allocation56_spill] sm:$0xff] %v3391_v13  ;;  %v3403_v42 = vpop.xlane.xlu1 %626 }
 0x221   :  { %v2278_v59 = vpop.eup %2277  ;;  %4065 = vst [vmem:[#allocation62_spill] sm:$0xff] %v3403_v42 }
 0x223   :  { %512 = vadd.xlane.f32.xlu1 %v2272_v9  ;;  %v3393_v46 = vpop.xlane.xlu0 %632 }
 0x224   :  { %4060 = vst [vmem:[#allocation57_spill] sm:$0xff] %v3393_v46 }
 0x227   :  { %508 = vadd.xlane.f32.xlu1 %v2274_v44  ;;  %v3395_v55 = vpop.xlane.xlu0 %634 }
 0x228   :  { %4061 = vst [vmem:[#allocation58_spill] sm:$0xff] %v3395_v55 }
 0x22b   :  { %514 = vadd.xlane.f32.xlu1 %v2276_v0  ;;  %v3397_v51 = vpop.xlane.xlu0 %636 }
 0x22c   :  { %4062 = vst [vmem:[#allocation59_spill] sm:$0xff] %v3397_v51 }
 0x22f   :  { %516 = vadd.xlane.f32.xlu1 %v2278_v59  ;;  %v3401_v10 = vpop.xlane.xlu0 %638 }
 0x230   :  { %4064 = vst [vmem:[#allocation61_spill] sm:$0xff] %v3401_v10 }
 0x27a   :  { %v1185_v9 = vpop.xlane.xlu0 %1184 }
 0x27c   :  { %v1183_v0 = vpop.xlane.xlu1 %1182 }
 0x27e   :  { %v1189_v44 = vpop.xlane.xlu0 %1188 }
 0x282   :  { %v1187_v59 = vpop.xlane.xlu0 %1186 }
 0x284   :  { %v1191_v41 = vpop.xlane.xlu1 %1190 }
 0x285   :  { %v1214_v56 = vmax.f32 %v1183_v0, %v1191_v41 }
 0x286   :  { %v1193_v21 = vpop.xlane.xlu0 %1192 }
 0x287   :  { %v1215_v55 = vmax.f32 %v1185_v9, %v1193_v21 }
 0x288   :  { %v1195_v54 = vpop.xlane.xlu1 %1194 }
 0x289   :  { %v1216_v51 = vmax.f32 %v1187_v59, %v1195_v54 }
 0x28a   :  { %v1197_v13 = vpop.xlane.xlu0 %1196 }
 0x28b   :  { %v1217_v32 = vmax.f32 %v1189_v44, %v1197_v13 }
 0x28c   :  { %v1199_v22 = vpop.xlane.xlu1 %1198 }
 0x28d   :  { %v1218_v40 = vmax.f32 %v1214_v56, %v1199_v22 }
 0x28e   :  { %v1201_v46 = vpop.xlane.xlu0 %1200 }
 0x28f   :  { %v1219_v10 = vmax.f32 %v1215_v55, %v1201_v46  ;;  %v488_v46 = vmul.f32 1.442695, %v3094_v30 }
 0x290   :  { %v1203_v33 = vpop.xlane.xlu1 %1202 }
 0x291   :  { %v1220_v42 = vmax.f32 %v1216_v51, %v1203_v33  ;;  %v1871_v51 = vadd.f32 -1.0, %v3124_v19 }
 0x292   :  { %v1205_v39 = vpop.xlane.xlu0 %1204 }
 0x293   :  { %v1221_v36 = vmax.f32 %v1217_v32, %v1205_v39  ;;  %v3454_v44 = vmul.f32 10.0, %v1871_v51 }
 0x294   :  { %v1207_v4 = vpop.xlane.xlu1 %1206 }
 0x295   :  { %v1222_v25 = vmax.f32 %v1218_v40, %v1207_v4  ;;  %v486_v4 = vmul.f32 1.442695, %v3064_v29 }
 0x296   :  { %v1209_v35 = vpop.xlane.xlu0 %1208 }
 0x297   :  { %v1223_v18 = vmax.f32 %v1219_v10, %v1209_v35 }
 0x298   :  { %v1211_v63 = vpop.xlane.xlu1 %1210 }
 0x299   :  { %v1224_v37 = vmax.f32 %v1220_v42, %v1211_v63  ;;  %v1226_v57 = vmax.f32 %v1222_v25, %v1223_v18  ;;  %v1872_v42 = vadd.f32 -1.0, %v3134_v14 }
 0x29a   :  { %v1213_v2 = vpop.xlane.xlu0 %1212 }
 0x29b   :  { %v1225_v15 = vmax.f32 %v1221_v36, %v1213_v2 }
 0x29d   :  { %v1227_v58 = vmax.f32 %v1224_v37, %v1225_v15 }
 0x29f   :  { %v1228_v41 = vmax.f32 %v1226_v57, %v1227_v58  ;;  %v3405_v21 = vpop.f32.mrf.mxu1 }
 0x2a0   :  { %1691 = vmax.xlane.f32.xlu1 %v3405_v21 }
 0x2a1   :  { %v1229_v54 = vrot.slane %v1228_v41, 4  ;;  %v3408_v22 = vpop.f32.mrf.mxu1 }
 0x2a3   :  { %v1230_v56 = vmax.f32 %v1228_v41, %v1229_v54  ;;  %v3410_v33 = vpop.f32.mrf.mxu1  ;;  %v3462_v41 = vmul.f32 10.0, %v1872_v42  ;;  %v1873_v42 = vadd.f32 -1.0, %v3107_v52 }
 0x2a4   :  { %1687 = vmax.xlane.f32.xlu1 %v3408_v22  ;;  %1693 = vmax.xlane.f32.xlu0 %v3410_v33 }
 0x2a5   :  { %v1231_v32 = vrot.slane %v1230_v56, 2  ;;  %v3414_v63 = vpop.f32.mrf.mxu1 }
 0x2a7   :  { %v1232_v2 = vmax.f32 %v1230_v56, %v1231_v32  ;;  %v3416_v37 = vpop.f32.mrf.mxu1  ;;  %v490_v32 = vmul.f32 1.442695, %v3454_v44 }
 0x2a8   :  { %1699 = vmax.xlane.f32.xlu1 %v3416_v37  ;;  %1689 = vmax.xlane.f32.xlu0 %v3414_v63 }
 0x2a9   :  { %v1233_v57 = vrot.slane %v1232_v2, 1  ;;  %v3420_v15 = vpop.f32.mrf.mxu1 }
 0x2ab   :  { %v1234_v58 = vmax.f32 %v1232_v2, %v1233_v57  ;;  %v3422_v25 = vpop.f32.mrf.mxu1 }
 0x2ac   :  { %1695 = vmax.xlane.f32.xlu1 %v3420_v15  ;;  %1701 = vmax.xlane.f32.xlu0 %v3422_v25 }
 0x2ad   :  { %2279 = vrcp.f32 %v1234_v58  ;;  %v3426_v36 = vpop.f32.mrf.mxu1 }
 0x2ae   :  { %2281 = vpow2.f32 %v486_v4  ;;  %v4073_v4 = vmov 0.0  }
 0x2af   :  { %v3429_v39 = vpop.f32.mrf.mxu1  ;;  %2283 = vpow2.f32 %v488_v46  ;;  %v617_v46 = vsel %vm3050_vm1, 1.0, %v4073_v4 }
 0x2b0   :  { %4066 = vst [vmem:[#allocation63_spill] sm:$0xff] %v3429_v39  ;;  %1707 = vmax.xlane.f32.xlu1 %v3429_v39  ;;  %1697 = vmax.xlane.f32.xlu0 %v3426_v36  ;;  %2285 = vpow2.f32 %v490_v32  ;;  %v3488_v32 = vmul.f32 10.0, %v1873_v42 }
 0x2b1   :  { %v3433_v18 = vpop.f32.mrf.mxu1 }
 0x2b3   :  { %v3435_v40 = vpop.f32.mrf.mxu1 }
 0x2b4   :  { %4067 = vst [vmem:[#allocation64_spill] sm:$0xff] %v3435_v40  ;;  %1703 = vmax.xlane.f32.xlu1 %v3433_v18  ;;  %1709 = vmax.xlane.f32.xlu0 %v3435_v40  ;;  %v4098_v40 = vld [vmem:[#allocation31_spill] sm:$0xff] }
 0x2b5   :  { %v3439_v13 = vpop.f32.mrf.mxu1 }
 0x2b6   :  { %4068 = vst [vmem:[#allocation65_spill] sm:$0xff] %v3439_v13 }
 0x2b7   :  { %v3442_v55 = vpop.f32.mrf.mxu1 }
 0x2b8   :  { %4069 = vst [vmem:[#allocation66_spill] sm:$0xff] %v3442_v55  ;;  %1715 = vmax.xlane.f32.xlu1 %v3442_v55  ;;  %1705 = vmax.xlane.f32.xlu0 %v3439_v13 }
 0x2b9   :  { %v3447_v35 = vpop.f32.mrf.mxu1 }
 0x2ba   :  { %4070 = vst [vmem:[#allocation67_spill] sm:$0xff] %v3447_v35  ;;  %v3449_v10 = vpop.eup %2279 }
 0x2bb   :  { %v3452_v9 = vpop.f32.mrf.mxu1  ;;  %v1236_v0 = vmul.f32 %v3449_v10, %v3205_v26  ;;  %v1237_v59 = vmul.f32 %v3449_v10, %v3190_v12  ;;  %v2282_v54 = vpop.eup %2281  ;;  %v1238_v2 = vmul.f32 %v3449_v10, %v3233_v8  ;;  %v492_v26 = vmul.f32 1.442695, %v3462_v41 }
 0x2bc   :  { %4071 = vst [vmem:[#allocation68_spill] sm:$0xff] %v3452_v9  ;;  %1711 = vmax.xlane.f32.xlu1 %v3447_v35  ;;  %1717 = vmax.xlane.f32.xlu0 %v3452_v9  ;;  %v563_v12 = vsel %vm2924_vm14, %v3306_v48, 0.0  ;;  %v1239_v51 = vmul.f32 %v3449_v10, %v3220_v20  ;;  %v1240_v8 = vmul.f32 %v3449_v10, %v3261_v49  ;;  %v1874_v48 = vadd.f32 -1.0, %v3129_v31  ;;  %v4095_v35 = vld [vmem:[#allocation24_spill] sm:$0xff] }
 0x2bd   :  { %v3464_v56 = vpop.f32.mrf.mxu1  ;;  %v1252_v57 = vsub.f32 1.0, %v1236_v0  ;;  %v1253_v58 = vsub.f32 1.0, %v1237_v59  ;;  %v1254_v0 = vsub.f32 1.0, %v1238_v2  ;;  %2287 = vpow2.f32 %v492_v26 }
 0x2be   :  { %4072 = vst [vmem:[#allocation69_spill] sm:$0xff] %v3464_v56  ;;  %v562_v20 = vsel %vm3018_vm7, %v3161_v11, 0.0  ;;  %v1255_v9 = vsub.f32 1.0, %v1239_v51  ;;  %v1241_v49 = vmul.f32 %v3449_v10, %v3265_v5  ;;  %v1256_v2 = vsub.f32 1.0, %v1240_v8 }
 0x2bf   :  { %v1268_v59 = vsub.f32 %v3027_v61, %v1252_v57  ;;  %v1269_v1 = vsub.f32 %v3031_v28, %v1253_v58  ;;  %v1270_v57 = vsub.f32 %v3025_v60, %v1254_v0  ;;  %vm4074_vm14 = vcmp.ne.s32.totalorder %v2830_v47, %v2832_v17 }
 0x2c0   :  { %518 = vadd.xlane.f32.xlu1 %v2282_v54  ;;  %1713 = vmax.xlane.f32.xlu0 %v3464_v56  ;;  %v2284_v54 = vpop.eup %2283  ;;  %v3499_v11 = vmul.f32 10.0, %v1874_v48  ;;  %v618_v26 = vsel %vm3082_vm2, 1.0, %v4073_v4  ;;  %v619_v5 = vsel %vm3118_vm9, 1.0, %v4073_v4  ;;  %v1242_v8 = vmul.f32 %v3449_v10, %v3292_v7  ;;  %v4094_v56 = vld [vmem:[#allocation53_spill] sm:$0xff] }
 0x2c1   :  { %v1284_v58 = vsel %vm4074_vm14, %v1268_v59, 0.0  ;;  %v1285_v43 = vsel %vm4075_vm6, %v1269_v1, 0.0  ;;  %v1257_v0 = vsub.f32 1.0, %v1241_v49  ;;  %v1272_v59 = vsub.f32 %v3035_v3, %v1256_v2  ;;  %v2286_v2 = vpop.eup %2285 }
 0x2c2   :  { %v1300_v51 = vmul.f32 %v1284_v58, %v1284_v58  ;;  %v1301_v42 = vmul.f32 %v1285_v43, %v1285_v43  ;;  %vm4076_vm7 = vcmp.ne.s32.totalorder %v2917_v23, %v2832_v17  ;;  %v496_v48 = vmul.f32 1.442695, %v3499_v11 }
 0x2c3   :  { %v1286_v1 = vsel %vm4076_vm7, %v1270_v57, 0.0  ;;  %v4078_v57 = vld [vmem:[#allocation42_spill] sm:$0xff]  ;;  %v1258_v43 = vsub.f32 1.0, %v1242_v8  ;;  %vm4096_vm5 = vnez %v4095_v35 }
 0x2c4   :  { %580 = vadd.xlane.f32.xlu1 %v563_v12  ;;  %640 = vadd.xlane.f32.xlu0 %v617_v46  ;;  %v1271_v12 = vsub.f32 %v3029_v27, %v1255_v9  ;;  %v494_v46 = vmul.f32 1.442695, %v3488_v32  ;;  %v564_v9 = vsel %vm2940_vm15, %v3145_v6, 0.0  ;;  %v1316_v49 = vadd.f32 %v1301_v42, %v1300_v51  ;;  %v4082_v51 = vld [vmem:[#allocation43_spill] sm:$0xff] }
 0x2c5   :  { %v1243_v58 = vmul.f32 %v3449_v10, %v4078_v57  ;;  %v1273_v6 = vsub.f32 %v4079_v50, %v1257_v0  ;;  %v1244_v42 = vmul.f32 %v3449_v10, %v4082_v51  ;;  %v4084_v57 = vld [vmem:[#allocation21_spill] sm:$0xff] }
 0x2c6   :  { %v1287_v7 = vsel %vm4077_vm10, %v1271_v12, 0.0  ;;  %2289 = vpow2.f32 %v494_v46 }
 0x2c7   :  { %2291 = vpow2.f32 %v496_v48  ;;  %v620_v48 = vsel %vm3072_vm3, 1.0, %v4073_v4 }
 0x2c8   :  { %520 = vadd.xlane.f32.xlu1 %v2284_v54  ;;  %578 = vadd.xlane.f32.xlu0 %v562_v20  ;;  %v565_v54 = vsel %vm2956_vm11, %v3279_v16, 0.0  ;;  %v1302_v20 = vmul.f32 %v1286_v1, %v1286_v1  ;;  %v1303_v16 = vmul.f32 %v1287_v7, %v1287_v7  ;;  %vm4085_vm11 = vcmp.ne.s32.totalorder %v4084_v57, %v2832_v17  ;;  %v4129_v57 = vld [vmem:[#allocation25_spill] sm:$0xff] }
 0x2c9   :  { %v1289_v0 = vsel %vm4085_vm11, %v1273_v6, 0.0 }
 0x2ca   :  { %v2288_v12 = vpop.eup %2287 }
 0x2cc   :  { %642 = vadd.xlane.f32.xlu0 %v618_v26  ;;  %644 = vadd.xlane.f32.xlu1 %v619_v5  ;;  %v4080_v26 = vld [vmem:[#allocation20_spill] sm:$0xff]  ;;  %v1317_v5 = vadd.f32 %v1316_v49, %v1302_v20  ;;  %v621_v20 = vsel %vm3103_vm4, 1.0, %v4073_v4  ;;  %v1305_v49 = vmul.f32 %v1289_v0, %v1289_v0 }
 0x2cd   :  { %vm4081_vm15 = vcmp.ne.s32.totalorder %v4080_v26, %v2832_v17 }
 0x2ce   :  { %v1288_v34 = vsel %vm4081_vm15, %v1272_v59, 0.0  ;;  %v1318_v1 = vadd.f32 %v1317_v5, %v1303_v16  ;;  %v4090_v5 = vld [vmem:[#allocation23_spill] sm:$0xff] }
 0x2cf   :  { %v1304_v46 = vmul.f32 %v1288_v34, %v1288_v34  ;;  %v4089_v34 = vld [vmem:[#allocation27_spill] sm:$0xff]  ;;  %vm4091_vm8 = vcmp.ne.s32.totalorder %v4090_v5, %v2832_v17 }
 0x2d0   :  { %582 = vadd.xlane.f32.xlu0 %v564_v9  ;;  %584 = vadd.xlane.f32.xlu1 %v565_v54  ;;  %v1259_v9 = vsub.f32 1.0, %v1243_v58  ;;  %v4083_v54 = vld [vmem:[#allocation26_spill] sm:$0xff] }
 0x2d1   :  { %v1274_v8 = vsub.f32 %v4083_v54, %v1258_v43  ;;  %v1319_v55 = vadd.f32 %v1318_v1, %v1304_v46  ;;  %v1260_v43 = vsub.f32 1.0, %v1244_v42  ;;  %v4092_v46 = vld [vmem:[#allocation48_spill] sm:$0xff]  ;;  %v4097_v42 = vld [vmem:[#allocation46_spill] sm:$0xff]  ;;  %v4104_v1 = vld [vmem:[#allocation9_spill] sm:$0xff] }
 0x2d2   :  { %v1275_v16 = vsub.f32 %v4089_v34, %v1259_v9  ;;  %v566_v51 = vsel %vm2973_vm12, %v4092_v46, 0.0  ;;  %v1246_v9 = vmul.f32 %v3449_v10, %v4097_v42  ;;  %v4112_v42 = vld [vmem:[#allocation18_spill] sm:$0xff]  ;;  %v4132_v34 = vld [vmem:[#allocation33_spill] sm:$0xff] }
 0x2d3   :  { %v1290_v6 = vsel %vm4091_vm8, %v1274_v8, 0.0  ;;  %v1276_v5 = vsub.f32 %v4098_v40, %v1260_v43  ;;  %v4099_v8 = vld [vmem:[#allocation8_spill] sm:$0xff]  ;;  %vm4113_vm7 = vcmp.ne.s32.totalorder %v4112_v42, %v2832_v17  ;;  %v4123_v40 = vld [vmem:[#allocation15_spill] sm:$0xff] }
 0x2d4   :  { %522 = vadd.xlane.f32.xlu0 %v2286_v2  ;;  %524 = vadd.xlane.f32.xlu1 %v2288_v12  ;;  %v4088_v2 = vld [vmem:[#allocation44_spill] sm:$0xff]  ;;  %v1320_v12 = vadd.f32 %v1319_v55, %v1305_v49  ;;  %v1306_v0 = vmul.f32 %v1290_v6, %v1290_v6  ;;  %vm4100_vm0 = vcmp.ne.s32.totalorder %v4099_v8, %v2832_v17  ;;  %v4103_v6 = vld [vmem:[#allocation14_spill] sm:$0xff]  ;;  %v2359_v8 = vld [vmem:[#allocation2 + $0x80] ss:$0 sm:$0xff] }
 0x2d5   :  { %v1245_v58 = vmul.f32 %v3449_v10, %v4088_v2  ;;  %v1291_v55 = vsel %vm4100_vm0, %v1275_v16, 0.0  ;;  %vm4105_vm13 = vcmp.eq.f32.partialorder %v4103_v6, %v4104_v1  ;;  %v4109_v16 = vld [vmem:[#allocation35_spill] sm:$0xff] }
 0x2d6   :  { %v1321_v49 = vadd.f32 %v1320_v12, %v1306_v0  ;;  %v1307_v35 = vmul.f32 %v1291_v55, %v1291_v55  ;;  %v4110_v0 = vld [vmem:[#allocation11_spill] sm:$0xff] }
 0x2d7   :  { %v1261_v2 = vsub.f32 1.0, %v1245_v58  ;;  %v4108_v58 = vld [vmem:[#allocation47_spill] sm:$0xff]  ;;  %vm4111_vm6 = vcmp.ne.s32.totalorder %v4110_v0, %v2832_v17 }
 0x2d8   :  { %646 = vadd.xlane.f32.xlu0 %v620_v48  ;;  %648 = vadd.xlane.f32.xlu1 %v621_v20  ;;  %v567_v48 = vsel %vm4096_vm5, %v4094_v56, 0.0  ;;  %v2290_v20 = vpop.eup %2289  ;;  %v4101_v56 = vld [vmem:[#allocation16_spill] sm:$0xff]  ;;  %v1247_v43 = vmul.f32 %v3449_v10, %v4108_v58  ;;  %v4114_v55 = vld [vmem:[#allocation19_spill] sm:$0xff]  ;;  %v1322_v6 = vadd.f32 %v1321_v49, %v1307_v35  ;;  %v4121_v35 = vld [vmem:[#allocation13_spill] sm:$0xff]  ;;  %vm4124_vm5 = vcmp.ne.s32.totalorder %v4123_v40, %v2832_v17 }
 0x2d9   :  { %v2292_v46 = vpop.eup %2291  ;;  %vm4102_vm12 = vcmp.ne.s32.totalorder %v4101_v56, %v2832_v17  ;;  %v1277_v12 = vsub.f32 %v4109_v16, %v1261_v2  ;;  %vm4115_vm10 = vcmp.eq.f32.partialorder %v4114_v55, %v4104_v1  ;;  %v4118_v58 = vld [vmem:[#allocation60_spill] sm:$0xff]  ;;  %v4119_v1 = vld [vmem:[#allocation49_spill] sm:$0xff]  ;;  %v4120_v16 = vld [vmem:[#allocation30_spill] sm:$0xff]  ;;  %vm4122_vm8 = vcmp.ne.s32.totalorder %v4121_v35, %v2832_v17 }
 0x2da   :  { %vm3567_vm14 = vmand %vm4105_vm13, %vm4102_vm12  ;;  %vm416_vm11 = vcmp.eq.f32.partialorder %v4118_v58, %v2359_v8  ;;  %v1248_v55 = vmul.f32 %v3449_v10, %v4119_v1  ;;  %v1263_v0 = vsub.f32 1.0, %v1247_v43  ;;  %vm4130_vm13 = vnez %v4129_v57  ;;  %v4131_v1 = vld [vmem:[#allocation50_spill] sm:$0xff] }
 0x2db   :  { %vm3583_vm15 = vmand %vm4115_vm10, %vm4113_vm7  ;;  %v1293_v58 = vsel %vm4122_vm8, %v1277_v12, 0.0  ;;  %v1249_v35 = vmul.f32 %v3449_v10, %v4131_v1  ;;  %vm4164_vm8 = vcmp.ne.s32.totalorder %v2917_v23, %v2832_v17 }
 0x2dc   :  { %586 = vadd.xlane.f32.xlu0 %v566_v51  ;;  %588 = vadd.xlane.f32.xlu1 %v567_v48  ;;  %v1262_v48 = vsub.f32 1.0, %v1246_v9  ;;  %v622_v9 = vsel %vm3567_vm14, 1.0, %v4073_v4  ;;  %vm3603_vm0 = vmand %vm416_vm11, %vm4124_vm5  ;;  %v1309_v12 = vmul.f32 %v1293_v58, %v1293_v58  ;;  %v1279_v13 = vsub.f32 %v4132_v34, %v1263_v0 }
 0x2dd   :  { %v576_v51 = vsel %vm3603_vm0, %v3488_v32, 0.0  ;;  %v575_v39 = vsel %vm3583_vm15, %v3462_v41, 0.0 }
 0x2de   :  { %v1278_v49 = vsub.f32 %v4120_v16, %v1262_v48  ;;  %v624_v48 = vsel %vm3603_vm0, 1.0, %v4073_v4  ;;  %v1264_v16 = vsub.f32 1.0, %v1248_v55  ;;  %v4139_v55 = vld [vmem:[#allocation29_spill] sm:$0xff]  ;;  %vm4166_vm0 = vcmp.ne.s32.totalorder %v4080_v26, %v2832_v17  ;;  %v4168_v26 = vld [vmem:[#allocation27_spill] sm:$0xff] }
 0x2df   :  { %v4140_v0 = vsel %vm3050_vm1, %v4139_v55, 0.0  ;;  %v4147_v55 = vld [vmem:[#allocation52_spill] sm:$0xff]  ;;  %vm4148_vm1 = vcmp.ne.s32.totalorder %v4101_v56, %v2832_v17 }
 0x2e0   :  { %526 = vadd.xlane.f32.xlu0 %v2290_v20  ;;  %528 = vadd.xlane.f32.xlu1 %v2292_v46  ;;  %v1292_v20 = vsel %vm4111_vm6, %v1276_v5, 0.0  ;;  %v623_v5 = vsel %vm3583_vm15, 1.0, %v4073_v4  ;;  %v1280_v1 = vsub.f32 %v3124_v19, %v1264_v16  ;;  %vm4163_vm15 = vcmp.ne.s32.totalorder %v2898_v24, %v2832_v17 }
 0x2e1   :  { %v1308_v2 = vmul.f32 %v1292_v20, %v1292_v20  ;;  %v4128_v20 = vld [vmem:[#allocation45_spill] sm:$0xff] }
 0x2e2   :  { %v568_v43 = vsel %vm4130_vm13, %v4128_v20, 0.0 }
 0x2e4   :  { %650 = vadd.xlane.f32.xlu0 %v622_v9  ;;  %652 = vadd.xlane.f32.xlu1 %v623_v5  ;;  %v1323_v9 = vadd.f32 %v1322_v6, %v1308_v2  ;;  %v4127_v5 = vld [vmem:[#allocation54_spill] sm:$0xff]  ;;  %v4135_v2 = vld [vmem:[#allocation17_spill] sm:$0xff] }
 0x2e5   :  { %vm417_vm12 = vcmp.eq.f32.partialorder %v4127_v5, %v2359_v8  ;;  %v4133_v6 = vld [vmem:[#allocation10_spill] sm:$0xff]  ;;  %vm4136_vm7 = vcmp.ne.s32.totalorder %v4135_v2, %v2832_v17 }
 0x2e6   :  { %vm4134_vm6 = vcmp.ne.s32.totalorder %v4133_v6, %v2832_v17  ;;  %vm3623_vm10 = vmand %vm417_vm12, %vm4136_vm7  ;;  %v1324_v5 = vadd.f32 %v1323_v9, %v1309_v12  ;;  %v4142_v6 = vld [vmem:[#allocation12_spill] sm:$0xff] }
 0x2e7   :  { %v1294_v8 = vsel %vm4134_vm6, %v1278_v49, 0.0  ;;  %v625_v58 = vsel %vm3623_vm10, 1.0, %v4073_v4  ;;  %v4141_v49 = vld [vmem:[#allocation51_spill] sm:$0xff]  ;;  %vm4143_vm11 = vcmp.ne.s32.totalorder %v4142_v6, %v2832_v17  ;;  %v4144_v4 = vld [vmem:[#allocation34_spill] sm:$0xff]  ;;  %vm4154_vm4 = vmmov %vm4136_vm7 }
 0x2e8   :  { %590 = vadd.xlane.f32.xlu0 %v568_v43  ;;  %654 = vadd.xlane.f32.xlu1 %v624_v48  ;;  %v1310_v20 = vmul.f32 %v1294_v8, %v1294_v8  ;;  %v1250_v43 = vmul.f32 %v3449_v10, %v4141_v49  ;;  %v1265_v48 = vsub.f32 1.0, %v1249_v35  ;;  %v1295_v9 = vsel %vm4143_vm11, %v1279_v13, 0.0 }
 0x2e9   :  { %v4145_v38 = vsel %vm3082_vm2, %v4144_v4, 0.0  ;;  %v4146_v8 = vsel %vm3072_vm3, %v3064_v29, 0.0  ;;  %v1251_v35 = vmul.f32 %v3449_v10, %v4147_v55  ;;  %v1296_v13 = vsel %vm4148_vm1, %v1280_v1, 0.0  ;;  %v4149_v29 = vld [vmem:[#allocation38_spill] sm:$0xff]  ;;  %v503_v4 = vpop.xlane.xlu1 %502 }
 0x2ea   :  { %v1325_v12 = vadd.f32 %v1324_v5, %v1310_v20  ;;  %v1266_v16 = vsub.f32 1.0, %v1250_v43  ;;  %v574_v5 = vsel %vm3567_vm14, %v3454_v44, 0.0  ;;  %v4150_v59 = vsel %vm3118_vm9, %v4149_v29, 0.0  ;;  %vm4153_vm9 = vmmov %vm4124_vm5 }
 0x2eb   :  { %v1312_v20 = vmul.f32 %v1296_v13, %v1296_v13  ;;  %v1267_v10 = vsub.f32 1.0, %v1251_v35  ;;  %vm4151_vm2 = vcmp.ne.s32.totalorder %v4112_v42, %v2832_v17  ;;  %v505_v13 = vpop.xlane.xlu0 %504  ;;  %vm738_vm3 = vcmask 7168  }
 0x2ec   :  { %592 = vadd.xlane.f32.xlu0 %v4140_v0  ;;  %656 = vadd.xlane.f32.xlu1 %v625_v58  ;;  %v1311_v58 = vmul.f32 %v1295_v9, %v1295_v9  ;;  %v1281_v0 = vsub.f32 %v3134_v14, %v1265_v48  ;;  %v1282_v49 = vsub.f32 %v3107_v52, %v1266_v16  ;;  %v4157_v52 = vld [vmem:[#allocation56_spill] sm:$0xff] }
 0x2ed   :  { %v1283_v1 = vsub.f32 %v3129_v31, %v1267_v10  ;;  %v692_v6 = vmax.f32 %v4157_v52, 1.0  ;;  %vm4162_vm14 = vcmp.ne.s32.totalorder %v2830_v47, %v2832_v17  ;;  %vm4165_vm5 = vcmp.ne.s32.totalorder %v2935_v53, %v2832_v17 }
 0x2ee   :  { %v1326_v45 = vadd.f32 %v1325_v12, %v1311_v58  ;;  %v1297_v43 = vsel %vm4151_vm2, %v1281_v0, 0.0  ;;  %v1298_v9 = vsel %vm4153_vm9, %v1282_v49, 0.0  ;;  %v499_v58 = vpop.xlane.xlu1 %498 }
 0x2ef   :  { %v1313_v44 = vmul.f32 %v1297_v43, %v1297_v43  ;;  %v1314_v32 = vmul.f32 %v1298_v9, %v1298_v9  ;;  %v1299_v30 = vsel %vm4154_vm4, %v1283_v1, 0.0  ;;  %2293 = vlog2.f32 %v499_v58  ;;  %v4155_v9 = vld [vmem:[#allocation62_spill] sm:$0xff] }
 0x2f0   :  { %594 = vadd.xlane.f32.xlu0 %v4145_v38  ;;  %598 = vadd.xlane.f32.xlu1 %v4146_v8  ;;  %v1327_v48 = vadd.f32 %v1326_v45, %v1312_v20  ;;  %v577_v38 = vsel %vm3623_vm10, %v3499_v11, 0.0  ;;  %v1315_v8 = vmul.f32 %v1299_v30, %v1299_v30 }
 0x2f2   :  { %v1328_v12 = vadd.f32 %v1327_v48, %v1313_v44  ;;  %v3685_v35 = vpop.xlane.xlu1 %510 }
 0x2f4   :  { %596 = vadd.xlane.f32.xlu0 %v4150_v59  ;;  %602 = vadd.xlane.f32.xlu1 %v574_v5  ;;  %v1329_v7 = vadd.f32 %v1328_v12, %v1314_v32  ;;  %v501_v5 = vpop.xlane.xlu0 %500  ;;  %v690_v12 = vmax.f32 %v4155_v9, 1.0  ;;  %v4156_v32 = vld [vmem:[#allocation55_spill] sm:$0xff] }
 0x2f5   :  { %2295 = vlog2.f32 %v501_v5  ;;  %v691_v30 = vmax.f32 %v4156_v32, 1.0 }
 0x2f6   :  { %v1330_v55 = vadd.f32 %v1329_v7, %v1315_v8  ;;  %v507_v46 = vpop.xlane.xlu1 %506  ;;  %2297 = vlog2.f32 %v503_v4 }
 0x2f7   :  { %2299 = vrcp.f32 %v690_v12 }
 0x2f8   :  { %600 = vadd.xlane.f32.xlu0 %v4152_v62  ;;  %606 = vadd.xlane.f32.xlu1 %v576_v51  ;;  %2301 = vrcp.f32 %v691_v30 }
 0x2f9   :  { %2303 = vlog2.f32 %v505_v13 }
 0x2fa   :  { %v3687_v41 = vpop.xlane.xlu1 %512  ;;  %2305 = vrcp.f32 %v692_v6  ;;  %v4159_v6 = vld [vmem:[#allocation58_spill] sm:$0xff] }
 0x2fb   :  { %2307 = vlog2.f32 %v507_v46 }
 0x2fc   :  { %604 = vadd.xlane.f32.xlu0 %v575_v39  ;;  %v2294_v5 = vpop.eup %2293 }
 0x2fe   :  { %v509_v16 = vpop.xlane.xlu1 %508 }
 0x2ff   :  { %2309 = vlog2.f32 %v509_v16 }
 0x300   :  { %608 = vadd.xlane.f32.xlu0 %v577_v38 }
 0x302   :  { %v3689_v0 = vpop.xlane.xlu1 %514 }
 0x304   :  { %1331 = vadd.xlane.f32.xlu0 %v1330_v55 }
 0x306   :  { %v3691_v45 = vpop.xlane.xlu1 %516 }
 0x329   :  { %v1692_v29 = vpop.xlane.xlu1 %1691 }
 0x32d   :  { %v1688_v57 = vpop.xlane.xlu1 %1687  ;;  %v1694_v11 = vpop.xlane.xlu0 %1693 }
 0x331   :  { %v1700_v59 = vpop.xlane.xlu1 %1699  ;;  %v1690_v20 = vpop.xlane.xlu0 %1689 }
 0x332   :  { %v1721_v8 = vmax.f32 %v1692_v29, %v1700_v59  ;;  %v2296_v29 = vpop.eup %2295 }
 0x335   :  { %v1696_v10 = vpop.xlane.xlu1 %1695  ;;  %v1702_v49 = vpop.xlane.xlu0 %1701 }
 0x336   :  { %v1722_v39 = vmax.f32 %v1694_v11, %v1702_v49  ;;  %v1719_v55 = vmax.f32 %v1688_v57, %v1696_v10  ;;  %v531_v57 = vmul.f32 0.6931472, %v2294_v5 }
 0x339   :  { %v1708_v43 = vpop.xlane.xlu1 %1707  ;;  %v1698_v48 = vpop.xlane.xlu0 %1697 }
 0x33a   :  { %v1720_v2 = vmax.f32 %v1690_v20, %v1698_v48  ;;  %v1725_v42 = vmax.f32 %v1721_v8, %v1708_v43 }
 0x33d   :  { %v1704_v51 = vpop.xlane.xlu1 %1703  ;;  %v1710_v62 = vpop.xlane.xlu0 %1709 }
 0x33e   :  { %v1726_v40 = vmax.f32 %v1722_v39, %v1710_v62  ;;  %v1723_v58 = vmax.f32 %v1719_v55, %v1704_v51  ;;  %v658_v51 = vmul.f32 %v4155_v9, %v531_v57  ;;  %v2298_v62 = vpop.eup %2297  ;;  %v4160_v9 = vld [vmem:[#allocation59_spill] sm:$0xff] }
 0x33f   :  { %v2300_v12 = vpop.eup %2299  ;;  %v535_v39 = vmul.f32 0.6931472, %v2298_v62  ;;  %v695_v8 = vmax.f32 %v4160_v9, 1.0  ;;  %v4161_v62 = vld [vmem:[#allocation61_spill] sm:$0xff] }
 0x340   :  { %v2302_v16 = vpop.eup %2301 }
 0x341   :  { %v1716_v44 = vpop.xlane.xlu1 %1715  ;;  %v1706_v1 = vpop.xlane.xlu0 %1705 }
 0x342   :  { %v1724_v31 = vmax.f32 %v1720_v2, %v1706_v1  ;;  %v1729_v11 = vmax.f32 %v1725_v42, %v1716_v44  ;;  %v4158_v44 = vld [vmem:[#allocation57_spill] sm:$0xff] }
 0x345   :  { %v1712_v7 = vpop.xlane.xlu1 %1711  ;;  %v1718_v38 = vpop.xlane.xlu0 %1717 }
 0x346   :  { %v1730_v56 = vmax.f32 %v1726_v40, %v1718_v38  ;;  %v1727_v49 = vmax.f32 %v1723_v58, %v1712_v7  ;;  %v533_v40 = vmul.f32 0.6931472, %v2296_v29  ;;  %v694_v7 = vmax.f32 %v4159_v6, 1.0  ;;  %v2304_v58 = vpop.eup %2303 }
 0x347   :  { %v537_v29 = vmul.f32 0.6931472, %v2304_v58 }
 0x348   :  { %v1732_v59 = vmax.f32 %v1729_v11, %v1730_v56  ;;  %v659_v1 = vmul.f32 %v4156_v32, %v533_v40  ;;  %v660_v32 = vmul.f32 %v4157_v52, %v535_v39  ;;  %v696_v52 = vmax.f32 %v4161_v62, 1.0 }
 0x349   :  { %v3696_v14 = vpop.xlane.xlu1 %518  ;;  %v1714_v4 = vpop.xlane.xlu0 %1713 }
 0x34a   :  { %v1728_v19 = vmax.f32 %v1724_v31, %v1714_v4  ;;  %v693_v31 = vmax.f32 %v4158_v44, 1.0 }
 0x34c   :  { %v1731_v20 = vmax.f32 %v1727_v49, %v1728_v19  ;;  %2311 = vrcp.f32 %v693_v31 }
 0x34d   :  { %v581_v10 = vpop.xlane.xlu1 %580  ;;  %v3698_v43 = vpop.xlane.xlu0 %640  ;;  %2313 = vrcp.f32 %v694_v7 }
 0x34e   :  { %v1733_v2 = vmax.f32 %v1731_v20, %v1732_v59  ;;  %v675_v30 = vsub.f32 %v659_v1, %v581_v10  ;;  %2315 = vrcp.f32 %v695_v8  ;;  %v2306_v20 = vpop.eup %2305 }
 0x34f   :  { %v2308_v40 = vpop.eup %2307  ;;  %2317 = vlog2.f32 %v3685_v35 }
 0x350   :  { %v1734_v48 = vrot.slane %v1733_v2, 4  ;;  %v723_v4 = vmul.f32 %v2302_v16, %v675_v30  ;;  %v539_v7 = vmul.f32 0.6931472, %v2308_v40  ;;  %2319 = vrcp.f32 %v696_v52 }
 0x351   :  { %v521_v13 = vpop.xlane.xlu1 %520  ;;  %v579_v42 = vpop.xlane.xlu0 %578  ;;  %2321 = vlog2.f32 %v3687_v41 }
 0x352   :  { %v674_v56 = vsub.f32 %v658_v51, %v579_v42  ;;  %v1735_v19 = vmax.f32 %v1733_v2, %v1734_v48  ;;  %v740_v2 = vsel %vm738_vm3, %v723_v4, 0.0  ;;  %v2310_v51 = vpop.eup %2309  ;;  %2323 = vlog2.f32 %v3689_v0 }
 0x353   :  { %2325 = vlog2.f32 %v3691_v45  ;;  %v662_v4 = vmul.f32 %v4159_v6, %v539_v7 }
 0x354   :  { %v722_v55 = vmul.f32 %v2300_v12, %v674_v56  ;;  %v1736_v5 = vrot.slane %v1735_v19, 2  ;;  %v661_v56 = vmul.f32 %v4158_v44, %v537_v29  ;;  %2327 = vlog2.f32 %v3696_v14 }
 0x355   :  { %v3704_v38 = vpop.xlane.xlu1 %644  ;;  %v3706_v46 = vpop.xlane.xlu0 %642  ;;  %v697_v29 = vmax.f32 %v3698_v43, 1.0  ;;  %2329 = vlog2.f32 %v521_v13 }
 0x356   :  { %v739_v57 = vsel %vm738_vm3, %v722_v55, 0.0  ;;  %v1737_v10 = vmax.f32 %v1735_v19, %v1736_v5  ;;  %v541_v19 = vmul.f32 0.6931472, %v2310_v51  ;;  %v698_v0 = vmax.f32 %v3706_v46, 1.0 }
 0x357   :  { %v741_v42 = vadd.f32 %v740_v2, %v739_v57  ;;  %v699_v51 = vmax.f32 %v3704_v38, 1.0 }
 0x358   :  { %v1738_v39 = vrot.slane %v1737_v10, 1  ;;  %v663_v5 = vmul.f32 %v4160_v9, %v541_v19 }
 0x359   :  { %v585_v11 = vpop.xlane.xlu1 %584  ;;  %v583_v49 = vpop.xlane.xlu0 %582 }
 0x35a   :  { %v676_v59 = vsub.f32 %v660_v32, %v583_v49  ;;  %v677_v16 = vsub.f32 %v661_v56, %v585_v11  ;;  %v2312_v55 = vpop.eup %2311  ;;  %v1739_v58 = vmax.f32 %v1737_v10, %v1738_v39 }
 0x35b   :  { %v2314_v49 = vpop.eup %2313 }
 0x35c   :  { %v724_v48 = vmul.f32 %v2306_v20, %v676_v59  ;;  %v725_v44 = vmul.f32 %v2312_v55, %v677_v16  ;;  %v2316_v59 = vpop.eup %2315  ;;  %2331 = vrcp.f32 %v1739_v58 }
 0x35d   :  { %v525_v31 = vpop.xlane.xlu1 %524  ;;  %v523_v1 = vpop.xlane.xlu0 %522 }
 0x35e   :  { %v742_v12 = vsel %vm738_vm3, %v724_v48, 0.0  ;;  %v744_v45 = vsel %vm738_vm3, %v725_v44, 0.0  ;;  %v2318_v10 = vpop.eup %2317  ;;  %2333 = vlog2.f32 %v523_v1 }
 0x35f   :  { %v743_v30 = vadd.f32 %v742_v12, %v741_v42  ;;  %2335 = vrcp.f32 %v697_v29  ;;  %v543_v13 = vmul.f32 0.6931472, %v2318_v10  ;;  %v2320_v39 = vpop.eup %2319 }
 0x360   :  { %2337 = vrcp.f32 %v698_v0 }
 0x361   :  { %v3716_v35 = vpop.xlane.xlu1 %648  ;;  %v3718_v8 = vpop.xlane.xlu0 %646  ;;  %v745_v6 = vadd.f32 %v744_v45, %v743_v30  ;;  %2339 = vlog2.f32 %v525_v31  ;;  %v664_v19 = vmul.f32 %v4161_v62, %v543_v13 }
 0x362   :  { %v700_v42 = vmax.f32 %v3718_v8, 1.0  ;;  %v2322_v30 = vpop.eup %2321  ;;  %v701_v55 = vmax.f32 %v3716_v35, 1.0 }
 0x363   :  { %v2324_v7 = vpop.eup %2323 }
 0x364   :  { %v2326_v16 = vpop.eup %2325  ;;  %v547_v62 = vmul.f32 0.6931472, %v2324_v7 }
 0x365   :  { %v589_v32 = vpop.xlane.xlu1 %588  ;;  %v587_v11 = vpop.xlane.xlu0 %586 }
 0x366   :  { %v679_v41 = vsub.f32 %v663_v5, %v589_v32  ;;  %v678_v57 = vsub.f32 %v662_v4, %v587_v11  ;;  %v2328_v44 = vpop.eup %2327  ;;  %v545_v5 = vmul.f32 0.6931472, %v2322_v30 }
 0x367   :  { %v2330_v11 = vpop.eup %2329 }
 0x368   :  { %v727_v20 = vmul.f32 %v2316_v59, %v679_v41  ;;  %v726_v9 = vmul.f32 %v2314_v49, %v678_v57  ;;  %v665_v29 = vmul.f32 %v3698_v43, %v545_v5 }
 0x369   :  { %v529_v14 = vpop.xlane.xlu1 %528  ;;  %v527_v40 = vpop.xlane.xlu0 %526 }
 0x36a   :  { %v746_v2 = vsel %vm738_vm3, %v726_v9, 0.0  ;;  %v748_v52 = vsel %vm738_vm3, %v727_v20, 0.0  ;;  %2341 = vlog2.f32 %v527_v40  ;;  %v3742_v49 = vpop.eup %2331 }
 0x36b   :  { %v747_v48 = vadd.f32 %v746_v2, %v745_v6  ;;  %2343 = vrcp.f32 %v699_v51  ;;  %v2334_v45 = vpop.eup %2333  ;;  %v1741_v43 = vmul.f32 %v3742_v49, %v3408_v22  ;;  %v666_v2 = vmul.f32 %v3706_v46, %v547_v62 }
 0x36c   :  { %2345 = vrcp.f32 %v700_v42  ;;  %v2336_v6 = vpop.eup %2335  ;;  %v1742_v51 = vmul.f32 %v3742_v49, %v3414_v63  ;;  %v549_v42 = vmul.f32 0.6931472, %v2326_v16  ;;  %v555_v30 = vmul.f32 0.6931472, %v2334_v45 }
 0x36d   :  { %v3733_v56 = vpop.xlane.xlu1 %652  ;;  %v3735_v12 = vpop.xlane.xlu0 %650  ;;  %v749_v1 = vadd.f32 %v748_v52, %v747_v48  ;;  %2347 = vlog2.f32 %v529_v14  ;;  %v551_v14 = vmul.f32 0.6931472, %v2328_v44  ;;  %v553_v48 = vmul.f32 0.6931472, %v2330_v11 }
 0x36e   :  { %v702_v4 = vmax.f32 %v3735_v12, 1.0  ;;  %2349 = vrcp.f32 %v701_v55  ;;  %v703_v57 = vmax.f32 %v3733_v56, 1.0  ;;  %v2338_v52 = vpop.eup %2337  ;;  %v667_v44 = vmul.f32 %v3704_v38, %v549_v42 }
 0x36f   :  { %v2340_v55 = vpop.eup %2339  ;;  %v1743_v63 = vmul.f32 %v3742_v49, %v3405_v21  ;;  %v669_v16 = vmul.f32 %v3716_v35, %v553_v48  ;;  %v1758_v11 = vsub.f32 %v3031_v28, %v1742_v51  ;;  %v670_v62 = vmul.f32 %v3735_v12, %v555_v30 }
 0x370   :  { %2351 = vrcp.f32 %v702_v4  ;;  %v1744_v38 = vmul.f32 %v3742_v49, %v3410_v33  ;;  %v1745_v21 = vmul.f32 %v3742_v49, %v3420_v15 }
 0x371   :  { %v3739_v58 = vpop.xlane.xlu1 %654  ;;  %v591_v31 = vpop.xlane.xlu0 %590  ;;  %2353 = vrcp.f32 %v703_v57  ;;  %v1759_v12 = vsub.f32 %v3025_v60, %v1743_v63 }
 0x372   :  { %v680_v32 = vsub.f32 %v664_v19, %v591_v31  ;;  %v704_v20 = vmax.f32 %v3739_v58, 1.0  ;;  %v1760_v60 = vsub.f32 %v3029_v27, %v1744_v38 }
 0x374   :  { %v728_v41 = vmul.f32 %v2320_v39, %v680_v32  ;;  %v668_v39 = vmul.f32 %v3718_v8, %v551_v14  ;;  %2355 = vrcp.f32 %v704_v20  ;;  %v1757_v8 = vsub.f32 %v3027_v61, %v1741_v43 }
 0x375   :  { %v3746_v59 = vpop.xlane.xlu1 %656  ;;  %v593_v0 = vpop.xlane.xlu0 %592 }
 0x376   :  { %v750_v9 = vsel %vm738_vm3, %v728_v41, 0.0  ;;  %v681_v10 = vsub.f32 %v665_v29, %v593_v0  ;;  %v557_v41 = vmul.f32 0.6931472, %v2340_v55  ;;  %v1773_v33 = vsel %vm4162_vm14, %v1757_v8, 0.0 }
 0x377   :  { %v751_v40 = vadd.f32 %v750_v9, %v749_v1  ;;  %v705_v1 = vmax.f32 %v3746_v59, 1.0  ;;  %v2342_v31 = vpop.eup %2341  ;;  %v1776_v8 = vsel %vm4165_vm5, %v1760_v60, 0.0 }
 0x378   :  { %v729_v13 = vmul.f32 %v2336_v6, %v681_v10  ;;  %v2344_v29 = vpop.eup %2343  ;;  %v559_v61 = vmul.f32 0.6931472, %v2342_v31  ;;  %v1746_v10 = vmul.f32 %v3742_v49, %v3426_v36  ;;  %v671_v43 = vmul.f32 %v3733_v56, %v557_v41 }
 0x379   :  { %v599_v7 = vpop.xlane.xlu1 %598  ;;  %v595_v19 = vpop.xlane.xlu0 %594  ;;  %2357 = vrcp.f32 %v705_v1  ;;  %v1747_v36 = vmul.f32 %v3742_v49, %v3416_v37  ;;  %v1775_v56 = vsel %vm4164_vm8, %v1759_v12, 0.0 }
 0x37a   :  { %v752_v22 = vsel %vm738_vm3, %v729_v13, 0.0  ;;  %v682_v46 = vsub.f32 %v666_v2, %v595_v19  ;;  %v684_v4 = vsub.f32 %v668_v39, %v599_v7  ;;  %v2346_v45 = vpop.eup %2345  ;;  %v1761_v13 = vsub.f32 %v3035_v3, %v1745_v21 }
 0x37b   :  { %v753_v5 = vadd.f32 %v752_v22, %v751_v40  ;;  %v2348_v9 = vpop.eup %2347  ;;  %v1774_v40 = vsel %vm4163_vm15, %v1758_v11, 0.0  ;;  %v672_v51 = vmul.f32 %v3739_v58, %v559_v61  ;;  %v1789_v7 = vmul.f32 %v1773_v33, %v1773_v33 }
 0x37c   :  { %v730_v32 = vmul.f32 %v2338_v52, %v682_v46  ;;  %v732_v6 = vmul.f32 %v2346_v45, %v684_v4  ;;  %v2350_v47 = vpop.eup %2349  ;;  %v561_v52 = vmul.f32 0.6931472, %v2348_v9  ;;  %v1790_v19 = vmul.f32 %v1774_v40, %v1774_v40 }
 0x37d   :  { %v603_v57 = vpop.xlane.xlu1 %602  ;;  %v597_v0 = vpop.xlane.xlu0 %596  ;;  %v1748_v58 = vmul.f32 %v3742_v49, %v3422_v25  ;;  %v1749_v46 = vmul.f32 %v3742_v49, %v3433_v18  ;;  %v1762_v31 = vsub.f32 %v4079_v50, %v1746_v10  ;;  %v1763_v63 = vsub.f32 %v4083_v54, %v1747_v36 }
 0x37e   :  { %v754_v35 = vsel %vm738_vm3, %v730_v32, 0.0  ;;  %v683_v20 = vsub.f32 %v667_v44, %v597_v0  ;;  %v686_v14 = vsub.f32 %v670_v62, %v603_v57  ;;  %v2352_v24 = vpop.eup %2351  ;;  %v758_v37 = vsel %vm738_vm3, %v732_v6, 0.0  ;;  %v4167_v57 = vld [vmem:[#allocation65_spill] sm:$0xff] }
 0x37f   :  { %v755_v28 = vadd.f32 %v754_v35, %v753_v5  ;;  %v2354_v44 = vpop.eup %2353  ;;  %v1777_v25 = vsel %vm4166_vm0, %v1761_v13, 0.0  ;;  %v1791_v32 = vmul.f32 %v1775_v56, %v1775_v56  ;;  %v1805_v18 = vadd.f32 %v1790_v19, %v1789_v7  ;;  %v4169_v35 = vld [vmem:[#allocation21_spill] sm:$0xff]  ;;  %v4179_v19 = vld [vmem:[#allocation67_spill] sm:$0xff] }
 0x380   :  { %v731_v15 = vmul.f32 %v2344_v29, %v683_v20  ;;  %v734_v27 = vmul.f32 %v2352_v24, %v686_v14  ;;  %v673_v50 = vmul.f32 %v3746_v59, %v561_v52  ;;  %v1750_v53 = vmul.f32 %v3742_v49, %v4167_v57  ;;  %v4176_v52 = vld [vmem:[#allocation35_spill] sm:$0xff]  ;;  %v4192_v57 = vld [vmem:[#allocation12_spill] sm:$0xff] }
 0x381   :  { %v607_v2 = vpop.xlane.xlu1 %606  ;;  %v601_v48 = vpop.xlane.xlu0 %600  ;;  %v1792_v0 = vmul.f32 %v1776_v8, %v1776_v8  ;;  %v1806_v38 = vadd.f32 %v1805_v18, %v1791_v32  ;;  %v1764_v61 = vsub.f32 %v4168_v26, %v1748_v58  ;;  %vm4170_vm12 = vcmp.ne.s32.totalorder %v4169_v35, %v2832_v17  ;;  %v4188_v18 = vld [vmem:[#allocation10_spill] sm:$0xff]  ;;  %v4195_v26 = vld [vmem:[#allocation16_spill] sm:$0xff] }
 0x382   :  { %v756_v42 = vsel %vm738_vm3, %v731_v15, 0.0  ;;  %v685_v39 = vsub.f32 %v669_v16, %v601_v48  ;;  %v688_v55 = vsub.f32 %v672_v51, %v607_v2  ;;  %v2356_v16 = vpop.eup %2355  ;;  %v762_v11 = vsel %vm738_vm3, %v734_v27, 0.0  ;;  %v4172_v15 = vld [vmem:[#allocation31_spill] sm:$0xff]  ;;  %v4180_v27 = vld [vmem:[#allocation30_spill] sm:$0xff] }
 0x383   :  { %v757_v30 = vadd.f32 %v756_v42, %v755_v28  ;;  %v1778_v59 = vsel %vm4170_vm12, %v1762_v31, 0.0  ;;  %v4171_v28 = vld [vmem:[#allocation63_spill] sm:$0xff]  ;;  %v1793_v12 = vmul.f32 %v1777_v25, %v1777_v25  ;;  %v1807_v33 = vadd.f32 %v1806_v38, %v1792_v0 }
 0x384   :  { %v733_v3 = vmul.f32 %v2350_v47, %v685_v39  ;;  %v736_v29 = vmul.f32 %v2356_v16, %v688_v55  ;;  %v1751_v10 = vmul.f32 %v3742_v49, %v4171_v28  ;;  %v1765_v40 = vsub.f32 %v4172_v15, %v1749_v46  ;;  %v4175_v47 = vld [vmem:[#allocation64_spill] sm:$0xff]  ;;  %v4183_v46 = vld [vmem:[#allocation69_spill] sm:$0xff]  ;;  %v4186_v16 = vld [vmem:[#allocation66_spill] sm:$0xff] }
 0x385   :  { %v759_v1 = vadd.f32 %v758_v37, %v757_v30  ;;  %v605_v22 = vpop.xlane.xlu0 %604  ;;  %v1794_v36 = vmul.f32 %v1778_v59, %v1778_v59  ;;  %v1808_v60 = vadd.f32 %v1807_v33, %v1793_v12  ;;  %v1752_v51 = vmul.f32 %v3742_v49, %v4175_v47  ;;  %v4177_v39 = vld [vmem:[#allocation8_spill] sm:$0xff]  ;;  %v4187_v25 = vld [vmem:[#allocation39_spill] sm:$0xff]  ;;  %v4198_v28 = vld [vmem:[#allocation18_spill] sm:$0xff] }
 0x386   :  { %v760_v23 = vsel %vm738_vm3, %v733_v3, 0.0  ;;  %v687_v5 = vsub.f32 %v671_v43, %v605_v22  ;;  %v2358_v20 = vpop.eup %2357  ;;  %v766_v6 = vsel %vm738_vm3, %v736_v29, 0.0  ;;  %v4173_v43 = vld [vmem:[#allocation23_spill] sm:$0xff]  ;;  %v1766_v42 = vsub.f32 %v4176_v52, %v1750_v53 }
 0x387   :  { %v761_v4 = vadd.f32 %v760_v23, %v759_v1  ;;  %vm4174_vm13 = vcmp.ne.s32.totalorder %v4173_v43, %v2832_v17  ;;  %vm4178_vm6 = vcmp.ne.s32.totalorder %v4177_v39, %v2832_v17  ;;  %v1809_v7 = vadd.f32 %v1808_v60, %v1794_v36  ;;  %v4181_v3 = vld [vmem:[#allocation11_spill] sm:$0xff]  ;;  %v4184_v23 = vld [vmem:[#allocation13_spill] sm:$0xff] }
 0x388   :  { %v735_v41 = vmul.f32 %v2354_v44, %v687_v5  ;;  %v1779_v2 = vsel %vm4174_vm13, %v1763_v63, 0.0  ;;  %v1780_v24 = vsel %vm4178_vm6, %v1764_v61, 0.0  ;;  %v1753_v37 = vmul.f32 %v3742_v49, %v4179_v19  ;;  %v4200_v33 = vld [vmem:[#allocation15_spill] sm:$0xff] }
 0x389   :  { %v763_v62 = vadd.f32 %v762_v11, %v761_v4  ;;  %v609_v54 = vpop.xlane.xlu0 %608  ;;  %v1795_v56 = vmul.f32 %v1779_v2, %v1779_v2  ;;  %v1767_v55 = vsub.f32 %v4180_v27, %v1751_v10  ;;  %vm4182_vm7 = vcmp.ne.s32.totalorder %v4181_v3, %v2832_v17 }
 0x38a   :  { %v764_v21 = vsel %vm738_vm3, %v735_v41, 0.0  ;;  %v689_v45 = vsub.f32 %v673_v50, %v609_v54  ;;  %v1781_v1 = vsel %vm4182_vm7, %v1765_v40, 0.0  ;;  %v1796_v22 = vmul.f32 %v1780_v24, %v1780_v24  ;;  %v4190_v41 = vld [vmem:[#allocation68_spill] sm:$0xff]  ;;  %v4202_v40 = vld [vmem:[#allocation17_spill] sm:$0xff] }
 0x38b   :  { %v765_v9 = vadd.f32 %v764_v21, %v763_v62  ;;  %v1810_v58 = vadd.f32 %v1809_v7, %v1795_v56  ;;  %v1754_v31 = vmul.f32 %v3742_v49, %v4183_v46  ;;  %v1768_v44 = vsub.f32 %v4132_v34, %v1752_v51  ;;  %v4191_v62 = vld [vmem:[#allocation41_spill] sm:$0xff] }
 0x38c   :  { %v737_v14 = vmul.f32 %v2358_v20, %v689_v45  ;;  %vm4185_vm10 = vcmp.ne.s32.totalorder %v4184_v23, %v2832_v17  ;;  %v1797_v63 = vmul.f32 %v1781_v1, %v1781_v1  ;;  %v1755_v4 = vmul.f32 %v3742_v49, %v4186_v16  ;;  %v4194_v21 = vld [vmem:[#allocation37_spill] sm:$0xff]  ;;  %v4197_v20 = vld [vmem:[#allocation40_spill] sm:$0xff] }
 0x38d   :  { %v767_v48 = vadd.f32 %v766_v6, %v765_v9  ;;  %v1782_v5 = vsel %vm4185_vm10, %v1766_v42, 0.0  ;;  %v1811_v8 = vadd.f32 %v1810_v58, %v1796_v22  ;;  %v1769_v32 = vsub.f32 %v4187_v25, %v1753_v37  ;;  %v1332_v47 = vpop.xlane.xlu0 %1331 }
 0x38e   :  { %v768_v13 = vsel %vm738_vm3, %v737_v14, 0.0  ;;  %vm4189_vm11 = vcmp.ne.s32.totalorder %v4188_v18, %v2832_v17  ;;  %v1798_v11 = vmul.f32 %v1782_v5, %v1782_v5  ;;  %v1756_v34 = vmul.f32 %v3742_v49, %v4190_v41 }
 0x38f   :  { %v769_v30 = vadd.f32 %v768_v13, %v767_v48  ;;  %v1783_v50 = vsel %vm4189_vm11, %v1767_v55, 0.0  ;;  %v1812_v29 = vadd.f32 %v1811_v8, %v1797_v63  ;;  %v1770_v54 = vsub.f32 %v4191_v62, %v1754_v31 }
 0x390   :  { %vm4193_vm1 = vcmp.ne.s32.totalorder %v4192_v57, %v2832_v17  ;;  %v1799_v0 = vmul.f32 %v1783_v50, %v1783_v50  ;;  %v1771_v45 = vsub.f32 %v4194_v21, %v1755_v4  ;;  %vm4196_vm2 = vcmp.ne.s32.totalorder %v4195_v26, %v2832_v17 }
 0x391   :  { %770 = vadd.xlane.f32.xlu1 %v769_v30  ;;  %v1784_v53 = vsel %vm4193_vm1, %v1768_v44, 0.0  ;;  %v1813_v38 = vadd.f32 %v1812_v29, %v1798_v11  ;;  %v1785_v61 = vsel %vm4196_vm2, %v1769_v32, 0.0  ;;  %v1772_v9 = vsub.f32 %v4197_v20, %v1756_v34 }
 0x392   :  { %v1800_v35 = vmul.f32 %v1784_v53, %v1784_v53  ;;  %vm4199_vm9 = vcmp.ne.s32.totalorder %v4198_v28, %v2832_v17  ;;  %v1801_v10 = vmul.f32 %v1785_v61, %v1785_v61  ;;  %vm4201_vm4 = vcmp.ne.s32.totalorder %v4200_v33, %v2832_v17 }
 0x393   :  { %v1814_v59 = vadd.f32 %v1813_v38, %v1799_v0  ;;  %v1786_v49 = vsel %vm4199_vm9, %v1770_v54, 0.0  ;;  %v1787_v6 = vsel %vm4201_vm4, %v1771_v45, 0.0  ;;  %vm4203_vm3 = vcmp.ne.s32.totalorder %v4202_v40, %v2832_v17 }
 0x394   :  { %v1802_v14 = vmul.f32 %v1786_v49, %v1786_v49  ;;  %v1788_v43 = vsel %vm4203_vm3, %v1772_v9, 0.0  ;;  %v1803_v2 = vmul.f32 %v1787_v6, %v1787_v6  ;;  %v1333_v51 = vrot.slane %v1332_v47, 4 }
 0x395   :  { %v1815_v12 = vadd.f32 %v1814_v59, %v1800_v35  ;;  %v1804_v36 = vmul.f32 %v1788_v43, %v1788_v43 }
 0x396   :  { %v1334_v52 = vadd.f32 %v1333_v51, %v1332_v47 }
 0x397   :  { %v1816_v15 = vadd.f32 %v1815_v12, %v1801_v10 }
 0x398   :  { %v1335_v42 = vrot.slane %v1334_v52, 2 }
 0x399   :  { %v1817_v48 = vadd.f32 %v1816_v15, %v1802_v14 }
 0x39a   :  { %v1336_v56 = vadd.f32 %v1335_v42, %v1334_v52 }
 0x39b   :  { %v1818_v60 = vadd.f32 %v1817_v48, %v1803_v2 }
 0x39c   :  { %v1337_v37 = vrot.slane %v1336_v56, 1 }
 0x39d   :  { %v1819_v13 = vadd.f32 %v1818_v60, %v1804_v36 }
 0x39e   :  { %v1338_v55 = vadd.f32 %v1337_v37, %v1336_v56 }
 0x39f   :  { %1820 = vadd.xlane.f32.xlu1 %v1819_v13 }
 0x41a   :  { %v771_v39 = vpop.xlane.xlu1 %770 }
 0x41b   :  { %v772_v24 = vrot.slane %v771_v39, 4 }
 0x41d   :  { %v773_v30 = vadd.f32 %v772_v24, %v771_v39 }
 0x41f   :  { %v774_v7 = vrot.slane %v773_v30, 2 }
 0x421   :  { %v775_v19 = vadd.f32 %v774_v7, %v773_v30 }
 0x423   :  { %v776_v27 = vrot.slane %v775_v19, 1 }
 0x425   :  { %v777_v17 = vadd.f32 %v776_v27, %v775_v19 }
 0x427   :  { %2147 = vpush %v777_v17 }
 0x428   :  { %2149 = vpush %v1338_v55  ;;  %v1821_v3 = vpop.xlane.xlu1 %1820 }
 0x429   :  { %v1822_v1 = vrot.slane %v1821_v3, 4 }
 0x42b   :  { %v1823_v22 = vadd.f32 %v1822_v1, %v1821_v3 }
 0x42d   :  { %v1824_v58 = vrot.slane %v1823_v22, 2 }
 0x42f   :  { %v1825_v46 = vadd.f32 %v1824_v58, %v1823_v22 }
 0x431   :  { %v1826_v31 = vrot.slane %v1825_v46, 1 }
 0x433   :  { %v1827_v44 = vadd.f32 %v1826_v31, %v1825_v46 }
 0x435   :  { %2151 = vpush %v1827_v44 }
 0x458   :  { %s2148_s14 = spop %2147 }
 0x459   :  { %s779_s15 = smul.f32 0.0078125, %s2148_s14  ;;  %s2150_s16 = spop %2149 }
 0x45a   :  { %s1340_s17 = smul.f32 6.1035156e-05, %s2150_s16 }
 0x45b   :  { %1831 = sst [smem:[#allocation5]] %s779_s15 }
 0x45c   :  { %1833 = sst [smem:[#allocation5 + $0x1]] %s1340_s17 }
 0x466   :  { %s2152_s18 = spop %2151 }
 0x467   :  { %s1829_s19 = smul.f32 6.1035156e-05, %s2152_s18 }
 0x469   :  { %1835 = sst [smem:[#allocation5 + $0x2]] %s1829_s19 }
 0x46a   :  { %1843 = dma.smem_to_hbm %s2399_s20, 16, %s3868_s1, [#allocation4]  }
 0x46b   :  { %2390 = dma.done.wait [#allocation4], 16  }
 0x46c   :  { %2391 = vsyncadd [#allocation4], 4294967280 }
 0x46d   :  { %1847 = sfence }
 0x46e   :  { %1848 = vsyncpa [#allocation3], 1 }
 0x46f   :  { %1849 = vsyncpa [#allocation4], 1 }

</bundles_post_ra>
